<compile_context>
chip_gen: v7x
topology: tpu7x:2x2x1
jax: 0.10.0
libtpu: 0.0.40
codegen_flags: <defaults>
</compile_context>

<pallas_src>
import functools
import math

import jax
import jax.numpy as jnp
from jax.experimental import pallas as pl
from jax.experimental.pallas import tpu as pltpu

LRELU_SLOPE = 0.1
NF = 64
_PATCH_BYTES = 2 * 1024 * 1024          # per-strip im2col / result budget
_VMEM_LIMIT = 32 * 1024 * 1024          # explicit scoped-VMEM limit (all gens)


# ----------------------------------------------------------------------------
# small helpers
# ----------------------------------------------------------------------------
def _ceil8(x):
    return ((x + 7) // 8) * 8


def _rows_target(cin, cout):
    r1 = _PATCH_BYTES // (9 * cin * 2)      # im2col patch bf16
    r2 = _PATCH_BYTES // (cout * 4)         # f32 matmul result
    return int(max(256, min(4096, r1, r2)))


def _pick_th(H, W, L, rows_target):
    """Largest divisor of H (multiple of L) with th*W <= rows_target."""
    divs = [d for d in range(L, H + 1, L) if H % d == 0]
    if not divs:
        return H
    ok = [d for d in divs if d * W <= rows_target]
    return max(ok) if ok else min(divs)


def _act_id(x):
    return x


def _act_relu(x):
    return jnp.maximum(x, 0.0)


def _act_lrelu(x):
    return jnp.where(x >= 0.0, x, LRELU_SLOPE * x)


def _act_lrelu_sq(x):   # lrelu applied twice (conv->lrelu->shuffle->lrelu folded)
    return jnp.where(x >= 0.0, x, (LRELU_SLOPE * LRELU_SLOPE) * x)


# ----------------------------------------------------------------------------
# in-kernel building blocks
# ----------------------------------------------------------------------------
def _fill_window(win_ref, xm_ref, xt_ref, xb_ref, th, w, halo):
    """Assemble a zero-padded (th + 2*halo, Wpad, C) window in VMEM scratch."""
    s = pl.program_id(1)
    ns = pl.num_programs(1)
    win_ref[...] = jnp.zeros_like(win_ref)
    win_ref[halo:halo + th, halo:halo + w, :] = xm_ref[0]

    @pl.when(s > 0)
    def _():
        win_ref[0:halo, halo:halo + w, :] = xt_ref[0]

    @pl.when(s < ns - 1)
    def _():
        win_ref[halo + th:halo + th + halo, halo:halo + w, :] = xb_ref[0]


def _conv3x3_compute(win, w9, b, act, r_out, w_valid):
    """3x3 'valid' conv of a padded window as ONE im2col matmul (K = 9*Cin).

    win: (r_out+2, >=ceil8(w_valid)+2, Cin) bf16 values.
    w9:  (9*Cin, Cout) bf16 (dy-major, dx, channel-minor row order).
    Returns f32 (r_out, ceil8(w_valid), Cout); caller slices to w_valid cols.
    """
    wcp = _ceil8(w_valid)
    pieces = []
    for dy in range(3):
        for dx in range(3):
            pieces.append(win[dy:dy + r_out, dx:dx + wcp, :])
    patch = jnp.concatenate(pieces, axis=-1)                 # (r_out, wcp, 9*Cin)
    k = patch.shape[-1]
    y = jax.lax.dot_general(
        patch.reshape(r_out * wcp, k), w9,
        dimension_numbers=(((1,), (0,)), ((), ())),
        preferred_element_type=jnp.float32)
    y = act(y + b)                                           # f32 epilogue
    return y.reshape(r_out, wcp, -1)


# ----------------------------------------------------------------------------
# Pallas kernels
# ----------------------------------------------------------------------------
def _conv3x3_kernel(xm_ref, xt_ref, xb_ref, w_ref, b_ref, o_ref, win_ref,
                    *, th, w_out, act):
    _fill_window(win_ref, xm_ref, xt_ref, xb_ref, th, w_out, 1)
    y = _conv3x3_compute(win_ref[...], w_ref[...], b_ref[...], act, th, w_out)
    o_ref[...] = y[:, :w_out, :].reshape(o_ref.shape).astype(o_ref.dtype)


def _conv_chain2_kernel(xm_ref, xt_ref, xb_ref, w1_ref, b1_ref, w2_ref, b2_ref,
                        o_ref, win_ref, mid_ref,
                        *, th, w_out, act1, act2, residual):
    s = pl.program_id(1)
    ns = pl.num_programs(1)
    _fill_window(win_ref, xm_ref, xt_ref, xb_ref, th, w_out, 2)

    # conv1 on the extended (th+2, w_out+2) domain so conv2 has its halo.
    m = _conv3x3_compute(win_ref[...], w1_ref[...], b1_ref[...], act1,
                         th + 2, w_out + 2)
    mid_ref[...] = jnp.zeros_like(mid_ref)
    mid_ref[:, 1:1 + w_out, :] = m[:, 1:1 + w_out, :].astype(mid_ref.dtype)

    # rows outside the image become conv2's zero padding
    @pl.when(s == 0)
    def _():
        mid_ref[0:1, :, :] = jnp.zeros((1,) + tuple(mid_ref.shape[1:]),
                                       mid_ref.dtype)

    @pl.when(s == ns - 1)
    def _():
        mid_ref[th + 1:th + 2, :, :] = jnp.zeros((1,) + tuple(mid_ref.shape[1:]),
                                                 mid_ref.dtype)

    y = _conv3x3_compute(mid_ref[...], w2_ref[...], b2_ref[...], act2, th, w_out)
    y = y[:, :w_out, :]
    if residual:
        y = y + xm_ref[0].astype(jnp.float32)
    o_ref[...] = y.reshape(o_ref.shape).astype(o_ref.dtype)


def _head_combine_kernel(srm, srt, srb, cmm, cmt, cmb,
                         wsr_ref, bsr_ref, wcm_ref, bcm_ref,
                         out_ref, lin_ref, wins_ref, winc_ref,
                         *, th, w_out):
    _fill_window(wins_ref, srm, srt, srb, th, w_out, 1)
    _fill_window(winc_ref, cmm, cmt, cmb, th, w_out, 1)
    sr = _conv3x3_compute(wins_ref[...], wsr_ref[...], bsr_ref[...],
                          _act_lrelu, th, w_out)[:, :w_out, :]
    cm = _conv3x3_compute(winc_ref[...], wcm_ref[...], bcm_ref[...],
                          _act_lrelu, th, w_out)[:, :w_out, :]
    chans = [jnp.sum(sr * cm[:, :, 3 * i:3 * i + 3], axis=-1, keepdims=True)
             for i in range(3)]
    comb = jnp.maximum(jnp.concatenate(chans, axis=-1), 0.0)
    out_ref[...] = comb.reshape(out_ref.shape).astype(out_ref.dtype)
    lin_ref[...] = sr.reshape(lin_ref.shape).astype(lin_ref.dtype)


# ----------------------------------------------------------------------------
# wrappers (pallas_call plumbing)
# ----------------------------------------------------------------------------
def _halo_specs(H, W, Cin, th, L):
    thL = th // L
    nblk = H // L
    main = pl.BlockSpec((1, th, W, Cin), lambda bi, si: (bi, si, 0, 0))
    top = pl.BlockSpec((1, L, W, Cin),
                       lambda bi, si: (bi, jnp.maximum(si * thL - 1, 0), 0, 0))
    bot = pl.BlockSpec((1, L, W, Cin),
                       lambda bi, si: (bi, jnp.minimum((si + 1) * thL, nblk - 1),
                                       0, 0))
    return main, top, bot


def _cparams():
    return pltpu.CompilerParams(dimension_semantics=("parallel", "parallel"),
                                vmem_limit_bytes=_VMEM_LIMIT)


def conv3x3(x, w, b, act=_act_id, out_dtype=jnp.bfloat16, rows_target=None):
    """x: (B,H,W,Cin) NHWC; w: (3,3,Cin,Cout); b: (Cout,)."""
    B, H, W, Cin = x.shape
    Cout = w.shape[-1]
    x = x.astype(jnp.bfloat16)
    w9 = w.reshape(9 * Cin, Cout).astype(jnp.bfloat16)
    b2 = b.reshape(1, Cout).astype(jnp.float32)
    if rows_target is None:
        rows_target = _rows_target(Cin, Cout)
    th = _pick_th(H, W, 1, rows_target)
    S = H // th
    win_w = _ceil8(W + 2) + 8
    main, top, bot = _halo_specs(H, W, Cin, th, 1)
    kern = functools.partial(_conv3x3_kernel, th=th, w_out=W, act=act)
    flops = 2 * B * H * W * 9 * Cin * Cout
    bytes_acc = B * H * W * (Cin + Cout) * 2 + 9 * Cin * Cout * 2 + Cout * 4
    return pl.pallas_call(
        kern,
        out_shape=jax.ShapeDtypeStruct((B, H, W, Cout), out_dtype),
        grid=(B, S),
        in_specs=[main, top, bot,
                  pl.BlockSpec((9 * Cin, Cout), lambda bi, si: (0, 0)),
                  pl.BlockSpec((1, Cout), lambda bi, si: (0, 0))],
        out_specs=pl.BlockSpec((1, th, W, Cout), lambda bi, si: (bi, si, 0, 0)),
        scratch_shapes=[pltpu.VMEM((th + 2, win_w, Cin), jnp.bfloat16)],
        compiler_params=_cparams(),
        cost_estimate=pl.CostEstimate(flops=flops, transcendentals=0,
                                      bytes_accessed=bytes_acc),
    )(x, x, x, w9, b2)


def conv_chain2(x, wb1, wb2, act1, act2, residual,
                out_dtype=jnp.bfloat16, rows_target=None):
    """Fused conv3x3 -> act1 -> conv3x3 -> act2 (+ input if residual)."""
    B, H, W, Cin = x.shape
    (w1, b1), (w2, b2) = wb1, wb2
    Cm, Cout = w1.shape[-1], w2.shape[-1]
    assert H % 2 == 0
    if residual:
        assert Cout == Cin
    x = x.astype(jnp.bfloat16)
    w1_9 = w1.reshape(9 * Cin, Cm).astype(jnp.bfloat16)
    w2_9 = w2.reshape(9 * Cm, Cout).astype(jnp.bfloat16)
    b1_2 = b1.reshape(1, Cm).astype(jnp.float32)
    b2_2 = b2.reshape(1, Cout).astype(jnp.float32)
    if rows_target is None:
        rows_target = min(_rows_target(Cin, Cm), _rows_target(Cm, Cout))
    th = _pick_th(H, W, 2, rows_target)
    S = H // th
    win_w = _ceil8(W + 4) + 8
    mid_w = _ceil8(W + 2) + 8
    main, top, bot = _halo_specs(H, W, Cin, th, 2)
    kern = functools.partial(_conv_chain2_kernel, th=th, w_out=W,
                             act1=act1, act2=act2, residual=residual)
    flops = 2 * B * H * W * 9 * (Cin * Cm + Cm * Cout)
    bytes_acc = B * H * W * (Cin + Cout) * 2 + 18 * (Cin * Cm + Cm * Cout)
    return pl.pallas_call(
        kern,
        out_shape=jax.ShapeDtypeStruct((B, H, W, Cout), out_dtype),
        grid=(B, S),
        in_specs=[main, top, bot,
                  pl.BlockSpec((9 * Cin, Cm), lambda bi, si: (0, 0)),
                  pl.BlockSpec((1, Cm), lambda bi, si: (0, 0)),
                  pl.BlockSpec((9 * Cm, Cout), lambda bi, si: (0, 0)),
                  pl.BlockSpec((1, Cout), lambda bi, si: (0, 0))],
        out_specs=pl.BlockSpec((1, th, W, Cout), lambda bi, si: (bi, si, 0, 0)),
        scratch_shapes=[pltpu.VMEM((th + 4, win_w, Cin), jnp.bfloat16),
                        pltpu.VMEM((th + 2, mid_w, Cm), jnp.bfloat16)],
        compiler_params=_cparams(),
        cost_estimate=pl.CostEstimate(flops=flops, transcendentals=0,
                                      bytes_accessed=bytes_acc),
    )(x, x, x, w1_9, b1_2, w2_9, b2_2)


def head_color_combine(sr_in, cm_in, wb_sr, wb_cm, rows_target=None):
    """Fused sr_conv4 + c_conv4 (+lrelu) + colour-matrix combine + final ReLU."""
    B, H, W, C = sr_in.shape
    (wsr, bsr), (wcm, bcm) = wb_sr, wb_cm
    sr_in = sr_in.astype(jnp.bfloat16)
    cm_in = cm_in.astype(jnp.bfloat16)
    w9s = wsr.reshape(9 * C, 3).astype(jnp.bfloat16)
    w9c = wcm.reshape(9 * C, 9).astype(jnp.bfloat16)
    b2s = bsr.reshape(1, 3).astype(jnp.float32)
    b2c = bcm.reshape(1, 9).astype(jnp.float32)
    if rows_target is None:
        rows_target = _rows_target(C, 16)
    th = _pick_th(H, W, 1, rows_target)
    S = H // th
    win_w = _ceil8(W + 2) + 8
    main, top, bot = _halo_specs(H, W, C, th, 1)
    kern = functools.partial(_head_combine_kernel, th=th, w_out=W)
    flops = 2 * B * H * W * 9 * C * 12 + 6 * B * H * W * 3
    bytes_acc = 2 * B * H * W * C * 2 + 2 * B * H * W * 3 * 4 + 18 * C * 12
    out_blk = pl.BlockSpec((1, th, W, 3), lambda bi, si: (bi, si, 0, 0))
    return pl.pallas_call(
        kern,
        out_shape=(jax.ShapeDtypeStruct((B, H, W, 3), jnp.float32),
                   jax.ShapeDtypeStruct((B, H, W, 3), jnp.float32)),
        grid=(B, S),
        in_specs=[main, top, bot, main, top, bot,
                  pl.BlockSpec((9 * C, 3), lambda bi, si: (0, 0)),
                  pl.BlockSpec((1, 3), lambda bi, si: (0, 0)),
                  pl.BlockSpec((9 * C, 9), lambda bi, si: (0, 0)),
                  pl.BlockSpec((1, 9), lambda bi, si: (0, 0))],
        out_specs=(out_blk, out_blk),
        scratch_shapes=[pltpu.VMEM((th + 2, win_w, C), jnp.bfloat16),
                        pltpu.VMEM((th + 2, win_w, C), jnp.bfloat16)],
        compiler_params=_cparams(),
        cost_estimate=pl.CostEstimate(flops=flops, transcendentals=0,
                                      bytes_accessed=bytes_acc),
    )(sr_in, sr_in, sr_in, cm_in, cm_in, cm_in, w9s, b2s, w9c, b2c)


# ----------------------------------------------------------------------------
# plain-JAX glue
# ----------------------------------------------------------------------------
def pixel_shuffle_nhwc(x, r):
    B, H, W, C = x.shape
    Co = C // (r * r)
    x = x.reshape(B, H, W, Co, r, r)
    x = jnp.transpose(x, (0, 1, 4, 2, 5, 3))
    return x.reshape(B, H * r, W * r, Co)


# ----------------------------------------------------------------------------
# parameters (synthetic, deterministic)
# ----------------------------------------------------------------------------
def _init_conv(key, cin, cout):
    kw, kb = jax.random.split(key)
    w = jax.random.normal(kw, (3, 3, cin, cout), jnp.float32) * (0.5 / math.sqrt(9 * cin))
    b = 0.01 * jax.random.normal(kb, (cout,), jnp.float32)
    return w, b


def init_params(nf=64, nframes=5, n_fe_blocks=2, back_RBs=4, seed=42):
    keys = iter(jax.random.split(jax.random.PRNGKey(seed), 64))
    p = {}
    p["dm1"] = _init_conv(next(keys), 4, 64)
    p["dm2"] = _init_conv(next(keys), 64, 64)
    p["dm3"] = _init_conv(next(keys), 16, 64)
    p["dm4"] = _init_conv(next(keys), 64, 64)
    p["conv_first"] = _init_conv(next(keys), 3, nf)
    p["fe"] = [(_init_conv(next(keys), nf, nf), _init_conv(next(keys), nf, nf))
               for _ in range(n_fe_blocks)]
    p["align"] = _init_conv(next(keys), nf * nframes, nf)
    p["bb"] = [(_init_conv(next(keys), nf, nf), _init_conv(next(keys), nf, nf))
               for _ in range(back_RBs)]
    p["sr1"] = _init_conv(next(keys), nf, nf * 4)
    p["sr2"] = _init_conv(next(keys), nf, nf * 4)
    p["sr3"] = _init_conv(next(keys), nf, nf)
    p["sr4"] = _init_conv(next(keys), nf, 3)
    p["c1"] = _init_conv(next(keys), nf, nf * 4)
    p["c2"] = _init_conv(next(keys), nf, nf * 4)
    p["c3"] = _init_conv(next(keys), nf, nf)
    p["c4"] = _init_conv(next(keys), nf, 9)
    return p


# ----------------------------------------------------------------------------
# model forward (scale == 4)
# ----------------------------------------------------------------------------
def rawvsr_forward(p, x, ref):
    """x: (B,N,4,H,W) raw frames; ref: (B,3,2H,2W).  Returns NCHW (out, lin)."""
    B, N, C, H, W = x.shape
    nf = NF

    # -- demosaic + feature extraction, all N frames batched into the grid ----
    xf = jnp.transpose(x.reshape(B * N, C, H, W), (0, 2, 3, 1))
    f = conv_chain2(xf, p["dm1"], p["dm2"], _act_lrelu, _act_lrelu_sq, residual=False)
    f = pixel_shuffle_nhwc(f, 2)                               # (B*N,2H,2W,16)
    f = conv_chain2(f, p["dm3"], p["dm4"], _act_lrelu, _act_lrelu, residual=False)
    for wb1, wb2 in p["fe"]:                                   # TODO(synk) stand-in
        f = conv_chain2(f, wb1, wb2, _act_relu, _act_id, residual=True)

    # -- alignment stand-in: channel-concat fusion conv -----------------------
    H2, W2 = 2 * H, 2 * W
    feas = jnp.transpose(f.reshape(B, N, H2, W2, nf), (0, 2, 3, 1, 4))
    feas = feas.reshape(B, H2, W2, N * nf)
    fea = conv3x3(feas, *p["align"], act=_act_lrelu)           # TODO(synk) AlignNet
    for wb1, wb2 in p["bb"]:                                   # TODO(synk) BackBone
        fea = conv_chain2(fea, wb1, wb2, _act_relu, _act_id, residual=True)

    # -- reference branch ------------------------------------------------------
    rf = conv3x3(jnp.transpose(ref, (0, 2, 3, 1)), *p["conv_first"], act=_act_lrelu)
    for wb1, wb2 in p["fe"]:
        rf = conv_chain2(rf, wb1, wb2, _act_relu, _act_id, residual=True)
    for wb1, wb2 in p["bb"]:
        rf = conv_chain2(rf, wb1, wb2, _act_relu, _act_id, residual=True)

    # -- scale == 4 SR / colour-matrix heads (lrelu folded into conv epilogue) -
    sr = pixel_shuffle_nhwc(conv3x3(fea, *p["sr1"], act=_act_lrelu), 2)
    sr = pixel_shuffle_nhwc(conv3x3(sr, *p["sr2"], act=_act_lrelu), 2)
    sr = conv3x3(sr, *p["sr3"], act=_act_lrelu)
    cm = pixel_shuffle_nhwc(conv3x3(rf, *p["c1"], act=_act_lrelu), 2)
    cm = pixel_shuffle_nhwc(conv3x3(cm, *p["c2"], act=_act_lrelu), 2)
    cm = conv3x3(cm, *p["c3"], act=_act_lrelu)

    out, lin_out = head_color_combine(sr, cm, p["sr4"], p["c4"])
    return jnp.transpose(out, (0, 3, 1, 2)), jnp.transpose(lin_out, (0, 3, 1, 2))


# ----------------------------------------------------------------------------
# lightweight numerical self-checks (multi-strip paths included)
# ----------------------------------------------------------------------------
def _ref_conv(x, w, b):
    y = jax.lax.conv_general_dilated(
        x.astype(jnp.float32), w.astype(jnp.float32), (1, 1), "SAME",
        dimension_numbers=("NHWC", "HWIO", "NHWC"),
        precision=jax.lax.Precision.HIGHEST)
    return y + b.reshape(1, 1, 1, -1)


def _q(a):
    return a.astype(jnp.bfloat16).astype(jnp.float32)


def _assert_close(a, b, name, tol=0.05):
    err = float(jnp.max(jnp.abs(a.astype(jnp.float32) - b)))
    scale = float(jnp.max(jnp.abs(b))) + 1e-6
    assert err <= tol * scale + tol, f"{name}: err={err} scale={scale}"


def _self_check():
    key = jax.random.PRNGKey(3)
    ks = jax.random.split(key, 12)
    x = jax.random.normal(ks[0], (2, 16, 8, 16), jnp.float32)
    w = 0.1 * jax.random.normal(ks[1], (3, 3, 16, 32), jnp.float32)
    b = 0.1 * jax.random.normal(ks[2], (32,), jnp.float32)
    out = conv3x3(x, w, b, act=_act_lrelu, rows_target=64)        # 2 strips
    _assert_close(out, _act_lrelu(_ref_conv(_q(x), _q(w), b)), "conv3x3")

    w1 = 0.1 * jax.random.normal(ks[3], (3, 3, 16, 16), jnp.float32)
    b1 = 0.1 * jax.random.normal(ks[4], (16,), jnp.float32)
    w2 = 0.1 * jax.random.normal(ks[5], (3, 3, 16, 16), jnp.float32)
    b2 = 0.1 * jax.random.normal(ks[6], (16,), jnp.float32)
    xr = jax.random.normal(ks[7], (1, 16, 8, 16), jnp.float32)
    out2 = conv_chain2(xr, (w1, b1), (w2, b2), _act_relu, _act_id,
                       residual=True, rows_target=32)             # 4 strips
    mid = _q(_act_relu(_ref_conv(_q(xr), _q(w1), b1)))
    ref2 = _q(xr) + _ref_conv(mid, _q(w2), b2)
    _assert_close(out2, ref2, "conv_chain2")

    wsr = 0.1 * jax.random.normal(ks[8], (3, 3, 16, 3), jnp.float32)
    bsr = 0.1 * jax.random.normal(ks[9], (3,), jnp.float32)
    wcm = 0.1 * jax.random.normal(ks[10], (3, 3, 16, 9), jnp.float32)
    bcm = 0.1 * jax.random.normal(ks[11], (9,), jnp.float32)
    o, lin = head_color_combine(xr, xr, (wsr, bsr), (wcm, bcm), rows_target=32)
    sr_ref = _act_lrelu(_ref_conv(_q(xr), _q(wsr), bsr))
    cm_ref = _act_lrelu(_ref_conv(_q(xr), _q(wcm), bcm))
    comb = jnp.stack([jnp.sum(sr_ref * cm_ref[..., 3 * i:3 * i + 3], axis=-1)
                      for i in range(3)], axis=-1)
    _assert_close(o, jnp.maximum(comb, 0.0), "head_combine")
    _assert_close(lin, sr_ref, "head_lin")


# ----------------------------------------------------------------------------
# demo
# ----------------------------------------------------------------------------
if __name__ == "__main__":
    _self_check()

    B, N, C, H, W = 1, 3, 4, 8, 8          # small shapes; scale=4, nf=64
    params = init_params(nf=NF, nframes=N, n_fe_blocks=2, back_RBs=2, seed=42)

    key = jax.random.PRNGKey(0)
    kx, kr = jax.random.split(key)
    x = jax.random.normal(kx, (B, N, C, H, W), jnp.float32)
    ref = jax.random.normal(kr, (B, 3, 2 * H, 2 * W), jnp.float32)

    fwd = jax.jit(rawvsr_forward)
    out, lin_out = fwd(params, x, ref)
    jax.block_until_ready((out, lin_out))

    assert out.shape == (B, 3, 8 * H, 8 * W), out.shape
    assert lin_out.shape == (B, 3, 8 * H, 8 * W), lin_out.shape
    assert bool(jnp.all(out >= 0.0))                       # final ReLU
    assert bool(jnp.all(jnp.isfinite(out)))
    assert bool(jnp.all(jnp.isfinite(lin_out)))
    print("KERNEL_OK")
</pallas_src>

<mosaic_0001>
module attributes {stable_mosaic.version = 11 : i64} {
  func.func @_conv3x3_kernel(%arg0: i32, %arg1: i32, %arg2: memref<1x8x8x16xbf16, #tpu.memory_space<vmem>>, %arg3: memref<1x1x8x16xbf16, #tpu.memory_space<vmem>>, %arg4: memref<1x1x8x16xbf16, #tpu.memory_space<vmem>>, %arg5: memref<144x32xbf16, #tpu.memory_space<vmem>>, %arg6: memref<1x32xf32, #tpu.memory_space<vmem>>, %arg7: memref<1x8x8x32xbf16, #tpu.memory_space<vmem>>, %arg8: memref<10x24x16xbf16, #tpu.memory_space<vmem>>) attributes {dimension_semantics = [#tpu.dimension_semantics<parallel>, #tpu.dimension_semantics<parallel>], iteration_bounds = array<i64: 2, 2>, scalar_prefetch = 0 : i64, scratch_operands = 1 : i64, tpu.core_type = #tpu.core_type<tc>, window_params = [{transform_indices = @transform_0, window_bounds = array<i64: 1, 8, 8, 16>}, {transform_indices = @transform_1, window_bounds = array<i64: 1, 1, 8, 16>}, {transform_indices = @transform_2, window_bounds = array<i64: 1, 1, 8, 16>}, {pipeline_mode = #tpu.pipeline_mode<synchronous>, transform_indices = @transform_3, window_bounds = array<i64: 144, 32>}, {pipeline_mode = #tpu.pipeline_mode<synchronous>, transform_indices = @transform_4, window_bounds = array<i64: 1, 32>}, {transform_indices = @transform_5, window_bounds = array<i64: 1, 8, 8, 32>}]} {
    %cst = arith.constant 0.000000e+00 : bf16
    %0 = vector.broadcast %cst : bf16 to vector<10x24x16xbf16>
    %c0 = arith.constant 0 : index
    %c0_0 = arith.constant 0 : index
    %c0_1 = arith.constant 0 : index
    %1 = vector.load %arg8[%c0, %c0_0, %c0_1] : memref<10x24x16xbf16, #tpu.memory_space<vmem>>, vector<10x24x16xbf16>
    tpu.vector_store %arg8[%c0, %c0_0, %c0_1], %0 {strides = array<i32>} : memref<10x24x16xbf16, #tpu.memory_space<vmem>>, vector<10x24x16xbf16>,
    %c0_2 = arith.constant 0 : index
    %c0_3 = arith.constant 0 : index
    %c0_4 = arith.constant 0 : index
    %c0_5 = arith.constant 0 : index
    %2 = vector.load %arg2[%c0_2, %c0_3, %c0_4, %c0_5] : memref<1x8x8x16xbf16, #tpu.memory_space<vmem>>, vector<1x8x8x16xbf16>
    %3 = vector.shape_cast %2 : vector<1x8x8x16xbf16> to vector<8x8x16xbf16>
    %c1 = arith.constant 1 : index
    %c1_6 = arith.constant 1 : index
    %c0_7 = arith.constant 0 : index
    %4 = vector.load %arg8[%c1, %c1_6, %c0_7] : memref<10x24x16xbf16, #tpu.memory_space<vmem>>, vector<8x8x16xbf16>
    tpu.vector_store %arg8[%c1, %c1_6, %c0_7], %3 {strides = array<i32>} : memref<10x24x16xbf16, #tpu.memory_space<vmem>>, vector<8x8x16xbf16>,
    %c0_i32 = arith.constant 0 : i32
    %5 = arith.cmpi sgt, %arg1, %c0_i32 : i32
    %6 = arith.extui %5 : i1 to i32
    %c0_i32_8 = arith.constant 0 : i32
    %7 = arith.cmpi ne, %6, %c0_i32_8 : i32
    scf.if %7 {
      %c0_24 = arith.constant 0 : index
      %c0_25 = arith.constant 0 : index
      %c0_26 = arith.constant 0 : index
      %c0_27 = arith.constant 0 : index
      %37 = vector.load %arg3[%c0_24, %c0_25, %c0_26, %c0_27] : memref<1x1x8x16xbf16, #tpu.memory_space<vmem>>, vector<1x1x8x16xbf16>
      %38 = vector.shape_cast %37 : vector<1x1x8x16xbf16> to vector<1x8x16xbf16>
      %c0_28 = arith.constant 0 : index
      %c1_29 = arith.constant 1 : index
      %c0_30 = arith.constant 0 : index
      %39 = vector.load %arg8[%c0_28, %c1_29, %c0_30] : memref<10x24x16xbf16, #tpu.memory_space<vmem>>, vector<1x8x16xbf16>
      tpu.vector_store %arg8[%c0_28, %c1_29, %c0_30], %38 {strides = array<i32>} : memref<10x24x16xbf16, #tpu.memory_space<vmem>>, vector<1x8x16xbf16>,
    } else {
    }
    %c1_i32 = arith.constant 1 : i32
    %8 = arith.cmpi slt, %arg1, %c1_i32 : i32
    %9 = arith.extui %8 : i1 to i32
    %c0_i32_9 = arith.constant 0 : i32
    %10 = arith.cmpi ne, %9, %c0_i32_9 : i32
    scf.if %10 {
      %c0_24 = arith.constant 0 : index
      %c0_25 = arith.constant 0 : index
      %c0_26 = arith.constant 0 : index
      %c0_27 = arith.constant 0 : index
      %37 = vector.load %arg4[%c0_24, %c0_25, %c0_26, %c0_27] : memref<1x1x8x16xbf16, #tpu.memory_space<vmem>>, vector<1x1x8x16xbf16>
      %38 = vector.shape_cast %37 : vector<1x1x8x16xbf16> to vector<1x8x16xbf16>
      %c9 = arith.constant 9 : index
      %c1_28 = arith.constant 1 : index
      %c0_29 = arith.constant 0 : index
      %39 = vector.load %arg8[%c9, %c1_28, %c0_29] : memref<10x24x16xbf16, #tpu.memory_space<vmem>>, vector<1x8x16xbf16>
      tpu.vector_store %arg8[%c9, %c1_28, %c0_29], %38 {strides = array<i32>} : memref<10x24x16xbf16, #tpu.memory_space<vmem>>, vector<1x8x16xbf16>,
    } else {
    }
    %c0_10 = arith.constant 0 : index
    %c0_11 = arith.constant 0 : index
    %c0_12 = arith.constant 0 : index
    %11 = vector.load %arg8[%c0_10, %c0_11, %c0_12] : memref<10x24x16xbf16, #tpu.memory_space<vmem>>, vector<10x24x16xbf16>
    %c0_13 = arith.constant 0 : index
    %c0_14 = arith.constant 0 : index
    %12 = vector.load %arg5[%c0_13, %c0_14] : memref<144x32xbf16, #tpu.memory_space<vmem>>, vector<144x32xbf16>
    %c0_15 = arith.constant 0 : index
    %c0_16 = arith.constant 0 : index
    %13 = vector.load %arg6[%c0_15, %c0_16] : memref<1x32xf32, #tpu.memory_space<vmem>>, vector<1x32xf32>
    %14 = vector.extract_strided_slice %11 {offsets = [0, 0, 0], sizes = [8, 8, 16], strides = [1, 1, 1]} : vector<10x24x16xbf16> to vector<8x8x16xbf16>
    %15 = vector.extract_strided_slice %11 {offsets = [0, 1, 0], sizes = [8, 8, 16], strides = [1, 1, 1]} : vector<10x24x16xbf16> to vector<8x8x16xbf16>
    %16 = vector.extract_strided_slice %11 {offsets = [0, 2, 0], sizes = [8, 8, 16], strides = [1, 1, 1]} : vector<10x24x16xbf16> to vector<8x8x16xbf16>
    %17 = vector.extract_strided_slice %11 {offsets = [1, 0, 0], sizes = [8, 8, 16], strides = [1, 1, 1]} : vector<10x24x16xbf16> to vector<8x8x16xbf16>
    %18 = vector.extract_strided_slice %11 {offsets = [1, 1, 0], sizes = [8, 8, 16], strides = [1, 1, 1]} : vector<10x24x16xbf16> to vector<8x8x16xbf16>
    %19 = vector.extract_strided_slice %11 {offsets = [1, 2, 0], sizes = [8, 8, 16], strides = [1, 1, 1]} : vector<10x24x16xbf16> to vector<8x8x16xbf16>
    %20 = vector.extract_strided_slice %11 {offsets = [2, 0, 0], sizes = [8, 8, 16], strides = [1, 1, 1]} : vector<10x24x16xbf16> to vector<8x8x16xbf16>
    %21 = vector.extract_strided_slice %11 {offsets = [2, 1, 0], sizes = [8, 8, 16], strides = [1, 1, 1]} : vector<10x24x16xbf16> to vector<8x8x16xbf16>
    %22 = vector.extract_strided_slice %11 {offsets = [2, 2, 0], sizes = [8, 8, 16], strides = [1, 1, 1]} : vector<10x24x16xbf16> to vector<8x8x16xbf16>
    %23 = tpu.concatenate %14, %15, %16, %17, %18, %19, %20, %21, %22 in 2 : vector<8x8x16xbf16>, vector<8x8x16xbf16>, vector<8x8x16xbf16>, vector<8x8x16xbf16>, vector<8x8x16xbf16>, vector<8x8x16xbf16>, vector<8x8x16xbf16>, vector<8x8x16xbf16>, vector<8x8x16xbf16> -> vector<8x8x144xbf16>
    %24 = vector.shape_cast %23 : vector<8x8x144xbf16> to vector<64x144xbf16>
    %cst_17 = arith.constant dense<0.000000e+00> : vector<64x32xf32>
    %25 = tpu.matmul %24, %12, %cst_17 {dimension_numbers = #tpu.dot_dimension_numbers<[1], [0], [0], [1], [0, 0, 1, 1], [], []>} : vector<64x144xbf16>, vector<144x32xbf16>, vector<64x32xf32> -> vector<64x32xf32>
    %26 = vector.broadcast %13 : vector<1x32xf32> to vector<64x32xf32>
    %27 = arith.addf %25, %26 : vector<64x32xf32>
    %cst_18 = arith.constant 0.000000e+00 : f32
    %28 = vector.broadcast %cst_18 : f32 to vector<64x32xf32>
    %29 = arith.cmpf oge, %27, %28 : vector<64x32xf32>
    %cst_19 = arith.constant 1.000000e-01 : f32
    %30 = vector.broadcast %cst_19 : f32 to vector<64x32xf32>
    %31 = arith.mulf %30, %27 : vector<64x32xf32>
    %32 = arith.select %29, %27, %31 : vector<64x32xi1>, vector<64x32xf32>
    %33 = vector.shape_cast %32 : vector<64x32xf32> to vector<8x8x32xf32>
    %34 = vector.shape_cast %33 : vector<8x8x32xf32> to vector<1x8x8x32xf32>
    %35 = arith.truncf %34 : vector<1x8x8x32xf32> to vector<1x8x8x32xbf16>
    %c0_20 = arith.constant 0 : index
    %c0_21 = arith.constant 0 : index
    %c0_22 = arith.constant 0 : index
    %c0_23 = arith.constant 0 : index
    %36 = vector.load %arg7[%c0_20, %c0_21, %c0_22, %c0_23] : memref<1x8x8x32xbf16, #tpu.memory_space<vmem>>, vector<1x8x8x32xbf16>
    tpu.vector_store %arg7[%c0_20, %c0_21, %c0_22, %c0_23], %35 {strides = array<i32>} : memref<1x8x8x32xbf16, #tpu.memory_space<vmem>>, vector<1x8x8x32xbf16>,
    return
  }
  func.func @transform_0(%arg0: i32, %arg1: i32) -> (i32, i32, i32, i32) {
    %c0_i32 = arith.constant 0 : i32
    %c0_i32_0 = arith.constant 0 : i32
    %c0_i32_1 = arith.constant 0 : i32
    return %arg0, %arg1, %c0_i32, %c0_i32_0 : i32, i32, i32, i32
  }
  func.func @transform_1(%arg0: i32, %arg1: i32) -> (i32, i32, i32, i32) {
    %c8_i32 = arith.constant 8 : i32
    %0 = arith.muli %arg1, %c8_i32 : i32
    %c1_i32 = arith.constant 1 : i32
    %1 = arith.subi %0, %c1_i32 : i32
    %c0_i32 = arith.constant 0 : i32
    %2 = arith.maxsi %1, %c0_i32 : i32
    %c0_i32_0 = arith.constant 0 : i32
    %c0_i32_1 = arith.constant 0 : i32
    %c0_i32_2 = arith.constant 0 : i32
    return %arg0, %2, %c0_i32_0, %c0_i32_1 : i32, i32, i32, i32
  }
  func.func @transform_2(%arg0: i32, %arg1: i32) -> (i32, i32, i32, i32) {
    %c1_i32 = arith.constant 1 : i32
    %0 = arith.addi %arg1, %c1_i32 : i32
    %c8_i32 = arith.constant 8 : i32
    %1 = arith.muli %0, %c8_i32 : i32
    %c15_i32 = arith.constant 15 : i32
    %2 = arith.minsi %1, %c15_i32 : i32
    %c0_i32 = arith.constant 0 : i32
    %c0_i32_0 = arith.constant 0 : i32
    %c0_i32_1 = arith.constant 0 : i32
    return %arg0, %2, %c0_i32, %c0_i32_0 : i32, i32, i32, i32
  }
  func.func @transform_3(%arg0: i32, %arg1: i32) -> (i32, i32) {
    %c0_i32 = arith.constant 0 : i32
    %c0_i32_0 = arith.constant 0 : i32
    %c0_i32_1 = arith.constant 0 : i32
    return %c0_i32, %c0_i32_0 : i32, i32
  }
  func.func @transform_4(%arg0: i32, %arg1: i32) -> (i32, i32) {
    %c0_i32 = arith.constant 0 : i32
    %c0_i32_0 = arith.constant 0 : i32
    %c0_i32_1 = arith.constant 0 : i32
    return %c0_i32, %c0_i32_0 : i32, i32
  }
  func.func @transform_5(%arg0: i32, %arg1: i32) -> (i32, i32, i32, i32) {
    %c0_i32 = arith.constant 0 : i32
    %c0_i32_0 = arith.constant 0 : i32
    %c0_i32_1 = arith.constant 0 : i32
    return %arg0, %arg1, %c0_i32, %c0_i32_0 : i32, i32, i32, i32
  }
}

</mosaic_0001>

<bundles_post_ra>
// kernel: tpu_custom_call.1
= control target key start
LH: loop header
LB: loop body
LE: loop exit
PB: predicated region body
PF: predicated region fallthrough
CT: control target
= control target key end

     0   :  { %s2780_s0 = inlined_call_operand.hbm [shape: bf16[2,16,8,16], index: 0, kind: input, shape index: {}]   ;;  %s2781_s1 = inlined_call_operand.hbm [shape: bf16[2,16,8,16], index: 1, kind: input, shape index: {}]   ;;  %s2782_s2 = inlined_call_operand.hbm [shape: bf16[2,16,8,16], index: 2, kind: input, shape index: {}]   ;;  %s2783_s3 = inlined_call_operand.vmem [shape: bf16[144,32], index: 3, kind: input, shape index: {}]   ;;  %s2784_s4 = inlined_call_operand.vmem [shape: f32[1,32], index: 4, kind: input, shape index: {}]   ;;  %s2785_s5 = inlined_call_operand.hbm [shape: bf16[2,16,8,32], index: 5, kind: output, shape index: {}]  }
   0x1   :  { %2804 = sst [smem:[#allocation26_spill]] %s2780_s0 }
   0x2   :  { %2805 = sst [smem:[#allocation27_spill]] %s2781_s1 }
   0x3   :  { %2806 = sst [smem:[#allocation28_spill]] %s2783_s3 }
   0x4   :  { %2807 = sst [smem:[#allocation29_spill]] %s2784_s4 }
   0x5   :  { %2808 = sst [smem:[#allocation30_spill]] %s2785_s5 }
   0x6   :  { %10 = vsyncpa [#allocation4], 0 }
   0x7   :  { %12 = vsyncpa [#allocation4 + $0x1], 0 }
   0x8   :  { %13 = vsyncpa [#allocation7], 0 }
   0x9   :  { %15 = vsyncpa [#allocation7 + $0x1], 0 }
   0xa   :  { %16 = vsyncpa [#allocation5], 0 }
   0xb   :  { %18 = vsyncpa [#allocation5 + $0x1], 0  ;;  %s1943_s18 = smov 0   ;;  %s1945_s19 = smov 0  }
   0xc   :  { %s1947_s20 = smov 0   ;;  %s1949_s21 = smov 0  }
   0xd   :  { %s1951_s22 = smov 0   ;;  %s1953_s23 = smov 0  }
   0xe   :  { %s1955_s24 = smov 0   ;;  %s1957_s25 = smov 0  }
   0xf   :  { %s1959_s26 = smov 0   ;;  %s1961_s27 = smov 0  }
  0x10   :  { %s1963_s28 = smov 0   ;;  %s1965_s29 = smov 0  }
  0x11   :  { %s1967_s30 = smov 0   ;;  %s1969_s6 = smov 0  }
  0x12 LB: > { %2809 = sst [smem:[#allocation14_spill]] %s1860_s22  ;;  %s2014_s7 = sadd.s32 4294967295, %s1896_s6   ;;  %s1896_s6 = sphi %s1969_s6, %s24_s6   ;;  %s1892_s30 = sphi %s1967_s30, %s2881_s30   ;;  %s1888_s29 = sphi %s1965_s29, %s2873_s29   ;;  %s1884_s28 = sphi %s1963_s28, %s2872_s28   ;;  %s1880_s27 = sphi %s1961_s27, %s2871_s27   ;;  %s1876_s26 = sphi %s1959_s26, %s2870_s26   ;;  %s1872_s25 = sphi %s1957_s25, %s2880_s25   ;;  %s1868_s24 = sphi %s1955_s24, %s2879_s24   ;;  %s1864_s23 = sphi %s1953_s23, %s2868_s23   ;;  %s1860_s22 = sphi %s1951_s22, %s2867_s22   ;;  %s1856_s21 = sphi %s1949_s21, %s2866_s21   ;;  %s1852_s20 = sphi %s1947_s20, %s2878_s20   ;;  %s1848_s19 = sphi %s1945_s19, %s2877_s19   ;;  %s1844_s18 = sphi %s1943_s18, %s2876_s18  }
  0x13   : > { %2810 = sst [smem:[#allocation15_spill]] %s1864_s23  ;;  %s33_s8 = sadd.s32 1, %s1888_s29 }
  0x14   : > { %2811 = sst [smem:[#allocation16_spill]] %s1876_s26  ;;  %p34_p0 = scmp.ge.s32.totalorder %s33_s8, 2 }
  0x15   : > { %2812 = sst [smem:[#allocation17_spill]] %s1880_s27  ;;  %s36_s9 = sadd.s32 1, %s1892_s30 }
  0x16   : > { %2813 = sst [smem:[#allocation18_spill]] %s1884_s28  ;;  %p2797_p1 = scmp.eq.s32.totalorder %s1896_s6, 0 }
  0x17   : > { %2814 = sst [smem:[#allocation19_spill]] %s1888_s29  ;;  %p2796_p2 = scmp.eq.s32.totalorder %s2014_s7, 0 }
  0x18   : > { %2815 = sst [smem:[#allocation20_spill]] %s1892_s30  ;;  %s2883_s8 = smov (%p34_p0, %s33_s8), 0 }
  0x19   : > { %2816 = sst [smem:[#allocation21_spill]] %s2883_s8  ;;  %s2885_s9 = smov (!%p34_p0, %s36_s9), %s1892_s30 }
  0x1a   : > { %s41_s10 = ssub.s32 %s1888_s29, %s2883_s8  ;;  %s2026_s11 = sshll.u32 %s1888_s29, 3 }
  0x1b   : > { %p38_p3 = scmp.ge.s32.totalorder %s2885_s9, 2  ;;  %s1379_s12 = sadd.s32 4294967295, %s2026_s11 }
  0x1c   : > { %p70_p4 = scmp.gt.s32.totalorder %s1379_s12, 0  ;;  %s1380_s13 = sshll.u32 %s2883_s8, 3 }
  0x1d   : > { %s2887_s9 = smov (%p38_p3, %s2885_s9), 0  ;;  %s1381_s15 = sadd.s32 4294967295, %s1380_s13 }
  0x1e   : > { %2817 = sst [smem:[#allocation22_spill]] %s2887_s9  ;;  %s2889_s12 = smov (!%p70_p4, %s1379_s12), 0 }
  0x1f   : > { %s2034_s14 = ssub.s32 %s1892_s30, %s2887_s9  ;;  %p74_p5 = scmp.gt.s32.totalorder %s1381_s15, 0 }
  0x20   : > { %s2037_s16 = sor.u32 %s41_s10, %s2034_s14  ;;  %s81_s17 = sadd.s32 1, %s1864_s23 }
  0x21   : > { %s2891_s15 = smov (!%p74_p5, %s1381_s15), 0  ;;  %p88_p7 = scmp.ne.s32.totalorder %s1864_s23, %s1860_s22 }
  0x22   : > { %p94_p8 = scmp.ne.s32.totalorder %s1860_s22, %s1856_s21  ;;  %s77_s9 = ssub.s32 %s2889_s12, %s2891_s15 }
  0x23   : > { %s2045_s8 = sadd.s32 8, %s1380_s13  ;;  %s78_s29 = sor.u32 %s77_s9, %s2034_s14 }
  0x24   : > { %p2050_p9 = por %p88_p7, %p2797_p1  ;;  %p79_p10 = scmp.eq.s32.totalorder %s78_s29, 0 }
  0x25   : > { %p2056_p11 = por %p94_p8, %p2796_p2  ;;  %p2795_p13 = scmp.lt.s32.totalorder %s1896_s6, 4 }
  0x26   : > { %s2062_s21 = scalar_select %p79_p10, %s1864_s23, %s81_s17  }
  0x27   : > { %s2819_s5 = scalar_select %p2056_p11, 1, 0 }
  0x28   : > { %2821 = sst [smem:[#allocation24_spill]] %s2062_s21  ;;  %s2066_s9 = sshll.u32 %s1892_s30, 4 }
  0x29   : > { %2820 = sst [smem:[#allocation23_spill]] %s2819_s5  ;;  %s253_s15 = sand.u32 1, %s1896_s6  }
  0x2a   : > { %s255_s29 = sand.u32 1, %s1864_s23   ;;  %s266_s4 = sadd.s32 %s2066_s9, %s2889_s12 }
  0x2b   : > { %s1390_s28 = sshll.u32 %s255_s29, 2  ;;  %s1394_s3 = sshll.u32 %s266_s4, 6 }
  0x2c   : > { %s2822_s1 = sld [smem:[#allocation27_spill]]  ;;  %s257_s17 = scalar_lea.vmem [#allocation6], %s1390_s28 }
  0x2d   : > { %s270_s30 = sshll.u32 %s257_s17, 4  ;;  %p2084_p0 = pnand %p2795_p13, %p2050_p9  ;;  %s2078_s30 = int_to_ptr.vmem [resolvable:$true] %s270_s30 }
  0x2f   : > { %p1654_p7 = pneg %p2084_p0 }
  0x32   : > { %s2076_s5 = scalar_lea.hbm %s2822_s1, %s1394_s3  ;;  %s2090_s3 = scalar_lea.sflag [#allocation7], %s253_s15 }
  0x33   : > { %s1652_s4 = scalar_lea.hbm %s2076_s5, 64  ;;  %s1657_s28 = scalar_lea.hbm %s2822_s1, 2048 }
  0x34   : > { %p1653_p5 = scmp.ne.s32.totalorder %s2076_s5, %s1652_s4  ;;  %p1658_p9 = scmp.lt.u32.totalorder %s2076_s5, %s2822_s1 }
  0x35   : > { %p1659_p12 = scmp.lt.u32.totalorder %s1657_s28, %s1652_s4  ;;  %p1661_p2 = scmp.lt.u32.totalorder %s1652_s4, %s2076_s5 }
  0x36   : > { %p1655_p8 = pnand %p1654_p7, %p1653_p5 }
  0x37   : > { %p1660_p13 = por %p1659_p12, %p1658_p9 }
  0x38   : > { %p1656_p10 = pneg %p1655_p8 }
  0x39   : > { %p1662_p1 = por %p1661_p2, %p1660_p13 }
  0x3b   : > { %p1663_p6 = pnand %p1662_p1, %p1656_p10 }
  0x3d   : > { %1666 = shalt.err (!%p1663_p6)
}
  0x3e   : > { %s1667_s15 = scalar_lea.vmem %s2078_s30, 64  ;;  %s1898_s29 = smov [#allocation6]  }
  0x3f   : > { %p1668_p5 = scmp.ne.s32.totalorder %s2078_s30, %s1667_s15  ;;  %s1672_s17 = sshll.u32 %s1898_s29, 4  ;;  %s1673_s17 = int_to_ptr.vmem [resolvable:$false] %s1672_s17 }
  0x40   : > { %s1674_s22 = scalar_lea.vmem %s1673_s17, 128  ;;  %p1675_p4 = scmp.lt.s32.totalorder %s2078_s30, %s1673_s17 }
  0x41   : > { %p1670_p8 = pnand %p1668_p5, %p1654_p7  ;;  %p1676_p12 = scmp.lt.s32.totalorder %s1674_s22, %s1667_s15 }
  0x43   : > { %p1671_p3 = pneg %p1670_p8  ;;  %p1677_p9 = por %p1676_p12, %p1675_p4 }
  0x45   : > { %p1678_p2 = pnand %p1677_p9, %p1671_p3 }
  0x47   : > { %1681 = shalt.err (!%p1678_p2)
}
  0x48   : > { %1491 = dma.hbm_to_vmem [thread:$0]  (!%p2084_p0), %s2076_s5, 64, %s2078_s30, %s2090_s3  }
  0x49   : > { %p2824_p1 = scmp.lt.s32.totalorder %s1896_s6, 5  ;;  %p2825_p6 = scmp.ge.s32.totalorder %s1896_s6, 1 }
  0x4a   : > { %s1377_s4 = sadd.s32 4294967294, %s1896_s6   ;;  %s45_s27 = sadd.s32 1, %s1876_s26 }
  0x4b   : > { %p2122_p13 = pnand %p2825_p6, %p2824_p1  ;;  %p2827_p3 = scmp.eq.s32.totalorder %s2037_s16, 0 }
  0x4c   : > { %p52_p4 = scmp.ne.s32.totalorder %s1876_s26, %s1872_s25  ;;  %p58_p7 = scmp.ne.s32.totalorder %s1872_s25, %s1868_s24 }
  0x4d   : > { %s2131_s28 = scalar_select %p2827_p3, %s1876_s26, %s45_s27  }
  0x4e   : > { %p198_p10 = scmp.eq.s32.totalorder %s2014_s7, 3  ;;  %p204_p5 = scmp.eq.s32.totalorder %s1377_s4, 3 }
  0x4f   : > { %2828 = sst [smem:[#allocation25_spill]] %s2131_s28  ;;  %p2829_p8 = scmp.eq.s32.totalorder %s1896_s6, 0 }
  0x50   : > { %p2830_p9 = scmp.eq.s32.totalorder %s2014_s7, 0  ;;  %p2146_p2 = por %p198_p10, %p52_p4 }
  0x51   : > { %p54_p12 = por %p2829_p8, %p52_p4  ;;  %p2150_p1 = por %p204_p5, %p58_p7 }
  0x52   : > { %p2142_p0 = por %p2830_p9, %p58_p7  ;;  %s230_s12 = sand.u32 1, %s1876_s26  }
  0x53   : > { %s2832_s30 = scalar_select %p2146_p2, 1, 0 }
  0x54   : > { %s2831_s5 = scalar_select %p2142_p0, 1, 0 }
  0x55   : > { %s2833_s16 = scalar_select %p2150_p1, 1, 0 }
  0x56   : > { %s2834_s10 = sadd.s32 %s2066_s9, %s2026_s11  ;;  %s1386_s29 = sshll.u32 %s230_s12, 5 }
  0x57   : > { %s1389_s15 = sshll.u32 %s2834_s10, 6  ;;  %s2835_s0 = sld [smem:[#allocation26_spill]] }
  0x58   : > { %s234_s27 = scalar_lea.vmem [#allocation3], %s1386_s29  ;;  %p2836_p6 = scmp.lt.s32.totalorder %s1896_s6, 4 }
  0x59   : > { %s243_s1 = sshll.u32 %s234_s27, 4  ;;  %s2171_s10 = scalar_lea.sflag [#allocation4], %s230_s12  ;;  %s2169_s1 = int_to_ptr.vmem [resolvable:$true] %s243_s1 }
  0x5a   : > { %p2165_p3 = pnand %p2836_p6, %p54_p12 }
  0x5c   : > { %p1684_p7 = pneg %p2165_p3 }
  0x5d   : > { %s2161_s4 = scalar_lea.hbm %s2835_s0, %s1389_s15  ;;  %s1687_s22 = scalar_lea.hbm %s2835_s0, 2048 }
  0x5e   : > { %s1682_s17 = scalar_lea.hbm %s2161_s4, 512  ;;  %p1688_p8 = scmp.lt.u32.totalorder %s2161_s4, %s2835_s0 }
  0x5f   : > { %p1683_p4 = scmp.ne.s32.totalorder %s2161_s4, %s1682_s17  ;;  %p1689_p12 = scmp.lt.u32.totalorder %s1687_s22, %s1682_s17 }
  0x60   : > { %p1691_p6 = scmp.lt.u32.totalorder %s1682_s17, %s2161_s4 }
  0x61   : > { %p1685_p10 = pnand %p1684_p7, %p1683_p4  ;;  %p1690_p9 = por %p1689_p12, %p1688_p8 }
  0x63   : > { %p1686_p5 = pneg %p1685_p10  ;;  %p1692_p1 = por %p1691_p6, %p1690_p9 }
  0x65   : > { %p1693_p2 = pnand %p1692_p1, %p1686_p5 }
  0x67   : > { %1696 = shalt.err (!%p1693_p2)
}
  0x68   : > { %s1697_s12 = scalar_lea.vmem %s2169_s1, 512  ;;  %s1899_s15 = smov [#allocation3]  }
  0x69   : > { %p1698_p4 = scmp.ne.s32.totalorder %s2169_s1, %s1697_s12  ;;  %s1702_s29 = sshll.u32 %s1899_s15, 4  ;;  %s1703_s29 = int_to_ptr.vmem [resolvable:$false] %s1702_s29 }
  0x6a   : > { %s1704_s26 = scalar_lea.vmem %s1703_s29, 1024  ;;  %p1705_p0 = scmp.lt.s32.totalorder %s2169_s1, %s1703_s29 }
  0x6b   : > { %p1700_p10 = pnand %p1698_p4, %p1684_p7  ;;  %p1706_p8 = scmp.lt.s32.totalorder %s1704_s26, %s1697_s12 }
  0x6d   : > { %p1701_p11 = pneg %p1700_p10  ;;  %p1707_p12 = por %p1706_p8, %p1705_p0 }
  0x6f   : > { %p1708_p9 = pnand %p1707_p12, %p1701_p11 }
  0x71   : > { %1711 = shalt.err (!%p1708_p9)
}
  0x72   : > { %s1900_s17 = smov 64   ;;  %s1901_s22 = smov 4  }
  0x73   : > { %1488 = dma.hbm_to_vmem [thread:$0]  (!%p2165_p3), %s2161_s4, 512, %s2169_s1, %s2171_s10, %s1900_s17, %s1900_s17, %s1901_s22  }
  0x74   : > { %s1454_s27 = sadd.s32 8, %s2026_s11  ;;  %s117_s12 = sadd.s32 1, %s1852_s20 }
  0x75   : > { %p106_p11 = scmp.lt.s32.totalorder %s1454_s27, 15  ;;  %p124_p0 = scmp.ne.s32.totalorder %s1852_s20, %s1848_s19 }
  0x76   : > { %p2838_p2 = scmp.lt.s32.totalorder %s2045_s8, 15  ;;  %p2839_p1 = scmp.eq.s32.totalorder %s1896_s6, 0 }
  0x77   : > { %s2895_s27 = smov (!%p106_p11, %s1454_s27), 15  ;;  %p130_p5 = scmp.ne.s32.totalorder %s1848_s19, %s1844_s18 }
  0x78   : > { %s2893_s8 = smov (!%p2838_p2, %s2045_s8), 15  ;;  %p2208_p7 = por %p124_p0, %p2839_p1 }
  0x79   : > { %s113_s29 = ssub.s32 %s2895_s27, %s2893_s8  ;;  %s279_s28 = sand.u32 1, %s1852_s20  }
  0x7a   : > { %s114_s26 = sor.u32 %s113_s29, %s2034_s14  ;;  %p2841_p3 = scmp.eq.s32.totalorder %s2014_s7, 0 }
  0x7b   : > { %p115_p4 = scmp.eq.s32.totalorder %s114_s26, 0  ;;  %s1395_s11 = sshll.u32 %s279_s28, 2 }
  0x7c   : > { %p2218_p6 = por %p130_p5, %p2841_p3  ;;  %s290_s4 = sadd.s32 %s2066_s9, %s2895_s27 }
  0x7d   : > { %s2224_s10 = scalar_select %p115_p4, %s1852_s20, %s117_s12  }
  0x7e   : > { %s2842_s1 = scalar_select %p2218_p6, 1, 0 }
  0x7f   : > { %s1398_s17 = sshll.u32 %s290_s4, 6  ;;  %s281_s22 = scalar_lea.vmem [#allocation8], %s1395_s11 }
  0x80   : > { %s294_s0 = sshll.u32 %s281_s22, 4  ;;  %s2229_s18 = scalar_lea.hbm %s2782_s2, %s1398_s17  ;;  %s2231_s0 = int_to_ptr.vmem [resolvable:$true] %s294_s0 }
  0x81   : > { %p2843_p10 = scmp.lt.s32.totalorder %s1896_s6, 4  ;;  %s1712_s14 = scalar_lea.hbm %s2229_s18, 64 }
  0x82   : > { %p1713_p12 = scmp.ne.s32.totalorder %s2229_s18, %s1712_s14  ;;  %s1717_s9 = scalar_lea.hbm %s2782_s2, 2048 }
  0x83   : > { %p2237_p8 = pnand %p2843_p10, %p2208_p7  ;;  %p1718_p2 = scmp.lt.u32.totalorder %s2229_s18, %s2782_s2 }
  0x84   : > { %p1719_p1 = scmp.lt.u32.totalorder %s1717_s9, %s1712_s14  ;;  %p1721_p5 = scmp.lt.u32.totalorder %s1712_s14, %s2229_s18 }
  0x85   : > { %p1714_p9 = pneg %p2237_p8 }
  0x86   : > { %p1720_p7 = por %p1719_p1, %p1718_p2 }
  0x87   : > { %p1715_p11 = pnand %p1714_p9, %p1713_p12 }
  0x88   : > { %p1722_p3 = por %p1721_p5, %p1720_p7 }
  0x89   : > { %p1716_p0 = pneg %p1715_p11 }
  0x8b   : > { %p1723_p4 = pnand %p1722_p3, %p1716_p0 }
  0x8d   : > { %1726 = shalt.err (!%p1723_p4)
}
  0x8e   : > { %s1727_s15 = scalar_lea.vmem %s2231_s0, 64  ;;  %s1902_s29 = smov [#allocation8]  }
  0x8f   : > { %p1728_p10 = scmp.ne.s32.totalorder %s2231_s0, %s1727_s15  ;;  %s1732_s28 = sshll.u32 %s1902_s29, 4  ;;  %s1733_s28 = int_to_ptr.vmem [resolvable:$false] %s1732_s28 }
  0x90   : > { %s1734_s26 = scalar_lea.vmem %s1733_s28, 128  ;;  %p1735_p6 = scmp.lt.s32.totalorder %s2231_s0, %s1733_s28 }
  0x91   : > { %p1730_p12 = pnand %p1728_p10, %p1714_p9  ;;  %p1736_p2 = scmp.lt.s32.totalorder %s1734_s26, %s1727_s15 }
  0x93   : > { %p1731_p11 = pneg %p1730_p12  ;;  %p1737_p1 = por %p1736_p2, %p1735_p6 }
  0x95   : > { %p1738_p7 = pnand %p1737_p1, %p1731_p11 }
  0x97   : > { %1741 = shalt.err (!%p1738_p7)
}
  0x98   : > { %1494 = dma.hbm_to_vmem [thread:$0]  (!%p2237_p8), %s2229_s18, 64, %s2231_s0, %s2090_s3  }
  0x99   : > { %303 = sbr.rel (%p2122_p13) target bundleno = 699 (0x2bb), region = 40  ;;  %s2270_s11 = sand.u32 (!%p2122_p13), 1, %s1872_s25  }
  0x9a   : > { %s1400_s4 = sshll.u32 (!%p2122_p13), %s2270_s11, 5  ;;  %s306_s17 = scalar_lea.sflag (!%p2122_p13), [#allocation4], %s2270_s11 }
  0x9b   : > { %s2276_s22 = scalar_lea.vmem (!%p2122_p13), [#allocation3], %s1400_s4  ;;  %p2845_p6 = scmp.ne.s32.totalorder (!%p2122_p13), %s2831_s5, 0 }
  0xa0   : > { %1827 = dma.done.wait (%p2845_p6), %s306_s17, 512  }
  0xa1   : > { %1829 = vsyncadd (%p2845_p6), %s306_s17, 4294966784  ;;  %s2846_s0 = sld [smem:[#allocation14_spill]]  ;;  %s2847_s3 = sld [smem:[#allocation23_spill]] }
  0xa2   : > { %s314_s13 = sand.u32 1, %s2014_s7  }
  0xa3   : > { %s315_s14 = scalar_lea.sflag [#allocation7], %s314_s13 }
  0xa7   : > { %s316_s18 = sand.u32 1, %s2846_s0   ;;  %p2848_p13 = scmp.ne.s32.totalorder %s2847_s3, 0 }
  0xa8   : > { %s2284_s8 = sshll.u32 %s316_s18, 2 }
  0xa9   : > { %s318_s23 = scalar_lea.vmem [#allocation6], %s2284_s8 }
  0xaa   : > { %1831 = dma.done.wait (%p2848_p13), %s315_s14, 64  }
  0xab   : > { %1833 = vsyncadd (%p2848_p13), %s315_s14, 4294967232  ;;  %s325_s21 = sand.u32 1, %s1848_s19   ;;  %p2849_p8 = scmp.ne.s32.totalorder %s2842_s1, 0 }
  0xac   : > { %s2292_s5 = sshll.u32 %s325_s21, 2 }
  0xad   : > { %s327_s9 = scalar_lea.vmem [#allocation8], %s2292_s5 }
  0xae   : > { %1835 = dma.done.wait (%p2849_p8), %s315_s14, 64  }
  0xaf   : > { %1837 = vsyncadd (%p2849_p8), %s315_s14, 4294967232  ;;  %vm375_vm0 = vcmask 125952   ;;  %v1903_v0 = vmov 0   ;;  %vm496_vm1 = vsmask.f32 7938  ;;  %vm501_vm2 = vcmask 122880  }
  0xb0   : > { %379 = vst.msk [vmem:[#allocation2 + $0xc] sm:$0xf] %vm375_vm0, %v1903_v0  ;;  %376 = vst.msk [vmem:[#allocation2] sm:$0xf] %vm375_vm0, %v1903_v0  ;;  %v406_v1 = vld [vmem:[%s2276_s22] sm:$0xf] }
  0xb1   : > { %377 = vst.msk [vmem:[#allocation2 + $0x4] sm:$0xf] %vm375_vm0, %v1903_v0  ;;  %380 = vst.msk [vmem:[#allocation2 + $0x10] sm:$0xf] %vm375_vm0, %v1903_v0  ;;  %v407_v2 = vld [vmem:[%s2276_s22 + $0x4] sm:$0xf] }
  0xb2   : > { %382 = vst.msk [vmem:[#allocation2 + $0x18] sm:$0xf] %vm375_vm0, %v1903_v0  ;;  %383 = vst.msk [vmem:[#allocation2 + $0x1c] sm:$0xf] %vm375_vm0, %v1903_v0  ;;  %v408_v3 = vld [vmem:[%s2276_s22 + $0x8] sm:$0xf] }
  0xb3   : > { %385 = vst.msk [vmem:[#allocation2 + $0x24] sm:$0xf] %vm375_vm0, %v1903_v0  ;;  %386 = vst.msk [vmem:[#allocation2 + $0x28] sm:$0xf] %vm375_vm0, %v1903_v0  ;;  %v415_v4 = vshrl.u32 %v406_v1, 16  ;;  %v418_v5 = vshll.u32 %v406_v1, 16 }
  0xb4   : > { %388 = vst.msk [vmem:[#allocation2 + $0x30] sm:$0xf] %vm375_vm0, %v1903_v0  ;;  %389 = vst.msk [vmem:[#allocation2 + $0x34] sm:$0xf] %vm375_vm0, %v1903_v0  ;;  %vm502_vm3 = vsmask.f32 256 }
  0xb5   : > { %391 = vst.msk [vmem:[#allocation2 + $0x3c] sm:$0xf] %vm375_vm0, %v1903_v0  ;;  %392 = vst.msk [vmem:[#allocation2 + $0x40] sm:$0xf] %vm375_vm0, %v1903_v0  ;;  %v423_v8 = vshrl.u32 %v407_v2, 16  ;;  %v426_v9 = vshll.u32 %v407_v2, 16 }
  0xb6   : > { %394 = vst.msk [vmem:[#allocation2 + $0x48] sm:$0xf] %vm375_vm0, %v1903_v0  ;;  %395 = vst.msk [vmem:[#allocation2 + $0x4c] sm:$0xf] %vm375_vm0, %v1903_v0  ;;  %v417_v10 = vrot.slane %v415_v4, 7  ;;  %v431_v13 = vshrl.u32 %v408_v3, 16 }
  0xb7   : > { %397 = vst.msk [vmem:[#allocation2 + $0x54] sm:$0xf] %vm375_vm0, %v1903_v0  ;;  %398 = vst.msk [vmem:[#allocation2 + $0x58] sm:$0xf] %vm375_vm0, %v1903_v0  ;;  %v498_v6 = vld [vmem:[#allocation2 + $0xc] sm:$0xf] }
  0xb8   : > { %400 = vst.msk [vmem:[#allocation2 + $0x60] sm:$0xf] %vm375_vm0, %v1903_v0  ;;  %401 = vst.msk [vmem:[#allocation2 + $0x64] sm:$0xf] %vm375_vm0, %v1903_v0  ;;  %v504_v7 = vld [vmem:[#allocation2 + $0x10] sm:$0x1]  ;;  %v420_v19 = vor.u32 %v418_v5, %v417_v10 }
  0xb9   : > { %403 = vst.msk [vmem:[#allocation2 + $0x6c] sm:$0xf] %vm375_vm0, %v1903_v0  ;;  %404 = vst.msk [vmem:[#allocation2 + $0x70] sm:$0xf] %vm375_vm0, %v1903_v0  ;;  %v507_v12 = vld [vmem:[#allocation2 + $0x18] sm:$0xf] }
  0xba   : > { %vm2343_vm4 = vmand %vm375_vm0, %vm496_vm1  ;;  %v434_v14 = vshll.u32 %v408_v3, 16  ;;  %v425_v16 = vrot.slane %v423_v8, 7  ;;  %v510_v17 = vld [vmem:[#allocation2 + $0x1c] sm:$0x1]  ;;  %v409_v18 = vld [vmem:[%s2276_s22 + $0xc] sm:$0xf] }
  0xbb   : > { %vm2347_vm5 = vmand %vm501_vm2, %vm502_vm3  ;;  %v421_v20 = vrot.slane %v417_v10, 4  ;;  %v433_v21 = vrot.slane %v431_v13, 7  ;;  %v513_v22 = vld [vmem:[#allocation2 + $0x24] sm:$0xf]  ;;  %v439_v23 = vshrl.u32 %v409_v18, 16  ;;  %v442_v27 = vshll.u32 %v409_v18, 16 }
  0xbc   : > { %v428_v24 = vor.u32 %v426_v9, %v425_v16  ;;  %v429_v25 = vrot.slane %v425_v16, 4  ;;  %v516_v26 = vld [vmem:[#allocation2 + $0x28] sm:$0x1]  ;;  %v499_v29 = vsel %vm2343_vm4, %v420_v19, %v498_v6  ;;  %v519_v33 = vld [vmem:[#allocation2 + $0x30] sm:$0xf]  ;;  %s2390_s7 = scalar_lea.vmem [#allocation9], %s1400_s4 }
  0xbd   : > { %v410_v28 = vld [vmem:[%s2276_s22 + $0x10] sm:$0xf]  ;;  %v505_v30 = vsel %vm2347_vm5, %v421_v20, %v504_v7  ;;  %v436_v31 = vor.u32 %v434_v14, %v433_v21  ;;  %v437_v32 = vrot.slane %v433_v21, 4  ;;  %500 = vst [vmem:[#allocation2 + $0xc] sm:$0xf] %v499_v29  ;;  %v441_v36 = vrot.slane %v439_v23, 7 }
  0xbe   : > { %506 = vst [vmem:[#allocation2 + $0x10] sm:$0x1] %v505_v30  ;;  %v508_v34 = vsel %vm2343_vm4, %v428_v24, %v507_v12  ;;  %v511_v35 = vsel %vm2347_vm5, %v429_v25, %v510_v17  ;;  %v522_v37 = vld [vmem:[#allocation2 + $0x34] sm:$0x1]  ;;  %v447_v38 = vshrl.u32 %v410_v28, 16  ;;  %v450_v42 = vshll.u32 %v410_v28, 16 }
  0xbf   : > { %v411_v39 = vld [vmem:[%s2276_s22 + $0x14] sm:$0xf]  ;;  %509 = vst [vmem:[#allocation2 + $0x18] sm:$0xf] %v508_v34  ;;  %512 = vst [vmem:[#allocation2 + $0x1c] sm:$0x1] %v511_v35  ;;  %v514_v40 = vsel %vm2343_vm4, %v436_v31, %v513_v22  ;;  %v517_v41 = vsel %vm2347_vm5, %v437_v32, %v516_v26  ;;  %v444_v46 = vor.u32 %v442_v27, %v441_v36 }
  0xc0   : > { %v525_v43 = vld [vmem:[#allocation2 + $0x3c] sm:$0xf]  ;;  %v455_v44 = vshrl.u32 %v411_v39, 16  ;;  %v412_v45 = vld [vmem:[%s2276_s22 + $0x18] sm:$0xf]  ;;  %v445_v47 = vrot.slane %v441_v36, 4 }
  0xc1   : > { %515 = vst [vmem:[#allocation2 + $0x24] sm:$0xf] %v514_v40  ;;  %518 = vst [vmem:[#allocation2 + $0x28] sm:$0x1] %v517_v41  ;;  %v449_v48 = vrot.slane %v447_v38, 7  ;;  %v458_v50 = vshll.u32 %v411_v39, 16  ;;  %v520_v55 = vsel %vm2343_vm4, %v444_v46, %v519_v33 }
  0xc2   : > { %v528_v49 = vld [vmem:[#allocation2 + $0x40] sm:$0x1]  ;;  %v457_v51 = vrot.slane %v455_v44, 7  ;;  %v531_v52 = vld [vmem:[#allocation2 + $0x48] sm:$0xf]  ;;  %v463_v53 = vshrl.u32 %v412_v45, 16  ;;  %v523_v56 = vsel %vm2347_vm5, %v445_v47, %v522_v37 }
  0xc3   : > { %v466_v54 = vshll.u32 %v412_v45, 16  ;;  %v452_v57 = vor.u32 %v450_v42, %v449_v48  ;;  %v453_v58 = vrot.slane %v449_v48, 4  ;;  %v534_v59 = vld [vmem:[#allocation2 + $0x4c] sm:$0x1]  ;;  %v413_v60 = vld [vmem:[%s2276_s22 + $0x1c] sm:$0xf] }
  0xc4   : > { %521 = vst [vmem:[#allocation2 + $0x30] sm:$0xf] %v520_v55  ;;  %524 = vst [vmem:[#allocation2 + $0x34] sm:$0x1] %v523_v56  ;;  %v460_v61 = vor.u32 %v458_v50, %v457_v51  ;;  %v461_v62 = vrot.slane %v457_v51, 4  ;;  %v465_v63 = vrot.slane %v463_v53, 7 }
  0xc5   : > { %v471_v1 = vshrl.u32 %v413_v60, 16  ;;  %v526_v2 = vsel %vm2343_vm4, %v452_v57, %v525_v43  ;;  %v529_v3 = vsel %vm2347_vm5, %v453_v58, %v528_v49  ;;  %v537_v4 = vld [vmem:[#allocation2 + $0x54] sm:$0xf]  ;;  %v540_v5 = vld [vmem:[#allocation2 + $0x58] sm:$0x1]  ;;  %v474_v6 = vshll.u32 %v413_v60, 16 }
  0xc6   : > { %527 = vst [vmem:[#allocation2 + $0x3c] sm:$0xf] %v526_v2  ;;  %530 = vst [vmem:[#allocation2 + $0x40] sm:$0x1] %v529_v3  ;;  %v532_v7 = vsel %vm2343_vm4, %v460_v61, %v531_v52  ;;  %v535_v8 = vsel %vm2347_vm5, %v461_v62, %v534_v59  ;;  %v468_v9 = vor.u32 %v466_v54, %v465_v63  ;;  %v469_v10 = vrot.slane %v465_v63, 4  ;;  %s2854_s1 = sld [smem:[#allocation17_spill]] }
  0xc7   : > { %533 = vst [vmem:[#allocation2 + $0x48] sm:$0xf] %v532_v7  ;;  %536 = vst [vmem:[#allocation2 + $0x4c] sm:$0x1] %v535_v8  ;;  %v473_v12 = vrot.slane %v471_v1, 7 }
  0xc8   : > { %v538_v13 = vsel %vm2343_vm4, %v468_v9, %v537_v4  ;;  %v541_v14 = vsel %vm2347_vm5, %v469_v10, %v540_v5  ;;  %v543_v16 = vld [vmem:[#allocation2 + $0x60] sm:$0xf]  ;;  %v546_v17 = vld [vmem:[#allocation2 + $0x64] sm:$0x1] }
  0xc9   : > { %539 = vst [vmem:[#allocation2 + $0x54] sm:$0xf] %v538_v13  ;;  %542 = vst [vmem:[#allocation2 + $0x58] sm:$0x1] %v541_v14  ;;  %v476_v18 = vor.u32 %v474_v6, %v473_v12  ;;  %v477_v19 = vrot.slane %v473_v12, 4 }
  0xcb   : > { %v544_v20 = vsel %vm2343_vm4, %v476_v18, %v543_v16  ;;  %v547_v21 = vsel %vm2347_vm5, %v477_v19, %v546_v17 }
  0xcc   : > { %545 = vst [vmem:[#allocation2 + $0x60] sm:$0xf] %v544_v20  ;;  %548 = vst [vmem:[#allocation2 + $0x64] sm:$0x1] %v547_v21  ;;  %p1404_p9 = scmp.le.s32.totalorder %s2854_s1, 0 }
  0xcd   : > { %v553_v22 = vld [vmem:[%s318_s23] sm:$0xf] (!%p1404_p9)  ;;  %v564_v26 = vld [vmem:[#allocation2] sm:$0xf] (!%p1404_p9)  ;;  %v567_v27 = vld [vmem:[#allocation2 + $0x4] sm:$0x1] (!%p1404_p9) }
  0xce   : > { %552 = sbr.rel (%p1404_p9) target bundleno = 214 (0xd6), region = 56  ;;  %v555_v23 = vshrl.u32 (!%p1404_p9), %v553_v22, 16  ;;  %v558_v24 = vshll.u32 (!%p1404_p9), %v553_v22, 16 }
  0xd0   : > { %v557_v25 = vrot.slane (!%p1404_p9), %v555_v23, 7 }
  0xd2   : > { %v560_v28 = vor.u32 (!%p1404_p9), %v558_v24, %v557_v25  ;;  %v561_v29 = vrot.slane (!%p1404_p9), %v557_v25, 4 }
  0xd4   : > { %v565_v30 = vsel (!%p1404_p9), %vm2343_vm4, %v560_v28, %v564_v26  ;;  %v568_v31 = vsel (!%p1404_p9), %vm2347_vm5, %v561_v29, %v567_v27 }
  0xd5   : > { %566 = vst [vmem:[#allocation2] sm:$0xf] %v565_v30  ;;  %569 = vst [vmem:[#allocation2 + $0x4] sm:$0x1] %v568_v31 }
  0xd6 PF: > { %s2855_s27 = sld [smem:[#allocation17_spill]] }
  0xdc   : > { %p1405_p0 = scmp.ge.s32.totalorder %s2855_s27, 1 }
  0xdd   : > { %v574_v32 = vld [vmem:[%s327_s9] sm:$0xf] (!%p1405_p0)  ;;  %v586_v36 = vld [vmem:[#allocation2 + $0x6c] sm:$0xf] (!%p1405_p0)  ;;  %v589_v37 = vld [vmem:[#allocation2 + $0x70] sm:$0x1] (!%p1405_p0) }
  0xde   : > { %573 = sbr.rel (%p1405_p0) target bundleno = 230 (0xe6), region = 60  ;;  %v576_v33 = vshrl.u32 (!%p1405_p0), %v574_v32, 16  ;;  %v579_v34 = vshll.u32 (!%p1405_p0), %v574_v32, 16 }
  0xe0   : > { %v578_v35 = vrot.slane (!%p1405_p0), %v576_v33, 7 }
  0xe2   : > { %v581_v38 = vor.u32 (!%p1405_p0), %v579_v34, %v578_v35  ;;  %v582_v39 = vrot.slane (!%p1405_p0), %v578_v35, 4 }
  0xe4   : > { %v587_v40 = vsel (!%p1405_p0), %vm2343_vm4, %v581_v38, %v586_v36  ;;  %v590_v41 = vsel (!%p1405_p0), %vm2347_vm5, %v582_v39, %v589_v37 }
  0xe5   : > { %588 = vst [vmem:[#allocation2 + $0x6c] sm:$0xf] %v587_v40  ;;  %591 = vst [vmem:[#allocation2 + $0x70] sm:$0x1] %v590_v41 }
  0xe6 PF: > { %v2406_v42 = vld [vmem:[#allocation2 + $0xc] sm:$0xf]  ;;  %v595_v43 = vld [vmem:[#allocation2 + $0x10] sm:$0xf]  ;;  %1117 = vmatprep.subr.bf16.mxu0 %v1903_v0  ;;  %1459 = vmatprep.subr.bf16.mxu1 %v1903_v0  ;;  %v2413_v45 = vld [vmem:[#allocation2] sm:$0xf] }
  0xe7   : > { %v2411_v44 = vcombine.low %v2406_v42, %v595_v43  ;;  %v593_v11 = vld [vmem:[#allocation2 + $0x4] sm:$0xf]  ;;  %v2415_v46 = vld [vmem:[#allocation2 + $0x30] sm:$0xf]  ;;  %v601_v47 = vld [vmem:[#allocation2 + $0x34] sm:$0xf]  ;;  %v1414_v18 = vcombine.low %v2406_v42, %v2406_v42 }
  0xe8   : > { %v1406_v15 = vcombine.low %v2413_v45, %v593_v11  ;;  %v2418_v48 = vld [vmem:[#allocation2 + $0x3c] sm:$0xf]  ;;  %v603_v49 = vld [vmem:[#allocation2 + $0x40] sm:$0xf]  ;;  %v1410_v51 = vcombine.low %v2415_v46, %v601_v47  ;;  %s1904_s12 = smov 32   ;;  %s1905_s15 = smov 16  }
  0xe9   : > { %v744_v50 = vrot.slane %v2411_v44, 1  ;;  %v1411_v52 = vcombine.low %v2418_v48, %v603_v49  ;;  %v681_v56 = vshll.u32 %v2411_v44, 16  ;;  %v679_v61 = vshrl.u32 %v2411_v44, 16  ;;  %s2856_s26 = sld [smem:[#allocation28_spill]]  ;;  %v597_v8 = vld [vmem:[#allocation2 + $0x1c] sm:$0xf] }
  0xea   : > { %v743_v53 = vrot.slane %v1406_v15, 1  ;;  %v672_v54 = vshrl.u32 %v1406_v15, 16  ;;  %v674_v55 = vshll.u32 %v1406_v15, 16  ;;  %v700_v57 = vshrl.u32 %v1410_v51, 16  ;;  %v2442_v10 = vld [vmem:[#allocation2 + $0x18] sm:$0xf] }
  0xeb   : > { %753 = vrot.lane.b32.xlu1 %v744_v50, %s1904_s12  ;;  %v702_v58 = vshll.u32 %v1410_v51, 16  ;;  %v709_v59 = vshll.u32 %v1411_v52, 16  ;;  %v683_v62 = vrot.slane %v681_v56, 1  ;;  %v707_v1 = vshrl.u32 %v1411_v52, 16  ;;  %v605_v16 = vld [vmem:[#allocation2 + $0x4c] sm:$0xf] }
  0xec   : > { %751 = vrot.lane.b32.xlu0 %v743_v53, %s1904_s12  ;;  %v676_v60 = vrot.slane %v674_v55, 1  ;;  %v2440_v9 = vrot.slane %v1410_v51, 1  ;;  %v2450_v13 = vrot.slane %v1411_v52, 1  ;;  %v1408_v14 = vcombine.low %v2442_v10, %v597_v8  ;;  %v2461_v19 = vld [vmem:[#allocation2 + $0x48] sm:$0xf]  ;;  %s1906_s8 = smov 48  }
  0xed   : > { %v704_v63 = vrot.slane %v702_v58, 1  ;;  %v711_v2 = vrot.slane %v709_v59, 1  ;;  %v684_v5 = vor.u32 %v683_v62, %v679_v61  ;;  %v2468_v20 = vcombine.low %v2442_v10, %v2442_v10  ;;  %s1907_s9 = smov 64   ;;  %v599_v37 = vld [vmem:[#allocation2 + $0x28] sm:$0xf]  ;;  %s1909_s0 = smov 96  }
  0xee   : > { %v677_v3 = vor.u32 %v676_v60, %v672_v54  ;;  %v1412_v21 = vcombine.low %v2461_v19, %v605_v16  ;;  %v688_v22 = vshll.u32 %v1408_v14, 16  ;;  %v2478_v24 = vcombine.low %v2418_v48, %v2418_v48  ;;  %v2515_v38 = vld [vmem:[#allocation2 + $0x24] sm:$0xf]  ;;  %v607_v43 = vld [vmem:[#allocation2 + $0x58] sm:$0xf]  ;;  %s1910_s3 = smov 112  }
  0xef   : > { %v2429_v4 = vor.u32 %v704_v63, %v700_v57  ;;  %v2434_v6 = vor.u32 %v711_v2, %v707_v1  ;;  %s2857_s4 = smov %s2856_s26  ;;  %v1643_v7 = vld [vmem:[%s2856_s26] sm:$0xff]   ;;  %v2485_v25 = vcombine.low %v2461_v19, %v2461_v19  ;;  %v686_v26 = vshrl.u32 %v1408_v14, 16  ;;  %s1908_s26 = smov 80   ;;  %v2527_v15 = vld [vmem:[#allocation2 + $0x54] sm:$0xf] }
  0xf0   : > { %727 = vrot.lane.b32.xlu0 %v677_v3, %s1905_s15  ;;  %1118 = vmatpush1.bf16.msra.mxu0 %v1643_v7  ;;  %v1644_v12 = vld [vmem:[%s2857_s4 + $0x8] sm:$0xff]   ;;  %v1645_v17 = vld [vmem:[%s2857_s4 + $0x10] sm:$0xff]   ;;  %v1646_v23 = vld [vmem:[%s2857_s4 + $0x18] sm:$0xff]   ;;  %v690_v27 = vrot.slane %v688_v22, 1  ;;  %v716_v28 = vshll.u32 %v1412_v21, 16  ;;  %v714_v31 = vshrl.u32 %v1412_v21, 16  ;;  %v1409_v40 = vcombine.low %v2515_v38, %v599_v37 }
  0xf1   : > { %735 = vrot.lane.b32.xlu1 %v2429_v4, %s1905_s15  ;;  %1468 = vmatpush1.bf16.msra.mxu1 %v1643_v7  ;;  %v1647_v29 = vld [vmem:[%s2857_s4 + $0x20] sm:$0xff]   ;;  %v1648_v33 = vld [vmem:[%s2857_s4 + $0x28] sm:$0xff]   ;;  %v1649_v35 = vld [vmem:[%s2857_s4 + $0x30] sm:$0xff]   ;;  %v745_v36 = vrot.slane %v1408_v14, 1  ;;  %v749_v41 = vrot.slane %v1412_v21, 1  ;;  %v1413_v47 = vcombine.low %v2527_v15, %v607_v43  ;;  %vm882_vm6 = vcmask 130048  }
  0xf2   : > { %1119 = vmatprep.subr.bf16.mxu0 %v1903_v0  ;;  %1460 = vmatprep.subr.bf16.mxu1 %v1903_v0  ;;  %v2496_v30 = vor.u32 %v690_v27, %v686_v26  ;;  %v718_v32 = vrot.slane %v716_v28, 1  ;;  %v1650_v39 = vld [vmem:[%s2857_s4 + $0x38] sm:$0xff]   ;;  %v746_v11 = vrot.slane %v1409_v40, 1  ;;  %v1651_v44 = vld [vmem:[%s2857_s4 + $0x40] sm:$0xff]   ;;  %v695_v51 = vshll.u32 %v1409_v40, 16  ;;  %s2858_s13 = sld [smem:[#allocation29_spill]] }
  0xf3   : > { %v750_v52 = vrot.slane %v1413_v47, 1  ;;  %v1420_v54 = vcombine.low %v2527_v15, %v2527_v15  ;;  %v693_v55 = vshrl.u32 %v1409_v40, 16  ;;  %v723_v57 = vshll.u32 %v1413_v47, 16  ;;  %v609_v61 = vld [vmem:[#allocation2 + $0x64] sm:$0xf]  ;;  %s2859_s18 = sld [smem:[#allocation17_spill]] }
  0xf4   : > { %729 = vrot.lane.b32.xlu0 %v684_v5, %s1905_s15  ;;  %1120 = vmatpush1.bf16.msra.mxu0 %v1644_v12  ;;  %v719_v34 = vor.u32 %v718_v32, %v714_v31  ;;  %v1427_v49 = vcombine.low %v745_v36, %v746_v11  ;;  %v697_v56 = vrot.slane %v695_v51, 1  ;;  %v721_v58 = vshrl.u32 %v1413_v47, 16  ;;  %v608_v62 = vld [vmem:[#allocation2 + $0x60] sm:$0xf]  ;;  %v611_v14 = vld [vmem:[#allocation2 + $0x70] sm:$0xf] }
  0xf5   : > { %737 = vrot.lane.b32.xlu1 %v2434_v6, %s1905_s15  ;;  %1469 = vmatpush1.bf16.msra.mxu1 %v1644_v12  ;;  %v1431_v53 = vcombine.low %v749_v41, %v750_v52  ;;  %v725_v59 = vrot.slane %v723_v57, 1  ;;  %v1417_v63 = vcombine.low %v2415_v46, %v2415_v46  ;;  %v2566_v1 = vcombine.low %v608_v62, %v609_v61  ;;  %v610_v16 = vld [vmem:[#allocation2 + $0x6c] sm:$0xf]  ;;  %s1239_s1 = sshll.u32 %s2390_s7, 4  ;;  %s2861_s28 = sld [smem:[#allocation30_spill]]  ;;  %s2698_s1 = int_to_ptr.vmem [resolvable:$true] %s1239_s1 }
  0xf6   : > { %1121 = vmatprep.subr.bf16.mxu0 %v1903_v0  ;;  %1461 = vmatprep.subr.bf16.mxu1 %v1903_v0  ;;  %v1421_v2 = vcombine.low %v608_v62, %v608_v62  ;;  %vm907_vm7 = vcmask 261120   ;;  %vm924_vm8 = vcmask 392192   ;;  %vm941_vm9 = vcmask 523264   ;;  %s1224_s22 = scalar_lea.sflag [#allocation5], %s2270_s11  ;;  %p2863_p3 = scmp.ne.s32.totalorder %s2832_s30, 0 }
  0xf7   : > { %1443 = vmatprep.mubr.msk.bf16.mxu0 %vm882_vm6, %v1427_v49  ;;  %1445 = vmatprep.mubr.msk.bf16.mxu1 %vm882_vm6, %v1431_v53  ;;  %v726_v60 = vor.u32 %v725_v59, %v721_v58  ;;  %v799_v3 = vshll.u32 %v2566_v1, 16  ;;  %v819_v12 = vrot.slane %v2566_v1, 1  ;;  %vm958_vm10 = vcmask 654336  }
  0xf8   : > { %759 = vrot.lane.b32.xlu0 %v2440_v9, %s1904_s12  ;;  %1122 = vmatpush1.bf16.msra.mxu0 %v1645_v17  ;;  %vm975_vm11 = vcmask 785408   ;;  %vm992_vm12 = vcmask 916480   ;;  %vm1214_vm14 = vcmask 257024  }
  0xf9   : > { %761 = vrot.lane.b32.xlu1 %v2450_v13, %s1904_s12  ;;  %1470 = vmatpush1.bf16.msra.mxu1 %v1645_v17  ;;  %v801_v7 = vrot.slane %v799_v3, 1  ;;  %v2587_v17 = vcombine.low %v610_v16, %v611_v14  ;;  %s1448_s14 = sshll.u32 %s2859_s18, 3 }
  0xfa   : > { %1123 = vmatprep.subr.bf16.mxu0 %v1903_v0  ;;  %1462 = vmatprep.subr.bf16.mxu1 %v1903_v0 }
  0xfb   : > { %v859_v21 = vshrl.u32 %v2587_v17, 16  ;;  %s2862_s17 = smov %s2861_s28 }
  0xfc   : > { %777 = vrot.lane.b32.xlu0 %v1414_v18, %s1906_s8  ;;  %1124 = vmatpush1.bf16.msra.mxu0 %v1646_v23  ;;  %v1423_v18 = vcombine.low %v610_v16, %v610_v16 }
  0xfd   : > { %779 = vrot.lane.b32.xlu1 %v2468_v20, %s1906_s8  ;;  %1471 = vmatpush1.bf16.msra.mxu1 %v1646_v23 }
  0xfe   : > { %1125 = vmatprep.subr.bf16.mxu0 %v1903_v0  ;;  %1463 = vmatprep.subr.bf16.mxu1 %v1903_v0 }
 0x100   : > { %785 = vrot.lane.b32.xlu0 %v2478_v24, %s1906_s8  ;;  %1126 = vmatpush1.bf16.msra.mxu0 %v1647_v29 }
 0x101   : > { %787 = vrot.lane.b32.xlu1 %v2485_v25, %s1906_s8  ;;  %1472 = vmatpush1.bf16.msra.mxu1 %v1647_v29 }
 0x102   : > { %1127 = vmatprep.subr.bf16.mxu0 %v1903_v0  ;;  %1464 = vmatprep.subr.bf16.mxu1 %v1903_v0 }
 0x104   : > { %803 = vrot.lane.b32.xlu0 %v684_v5, %s1907_s9  ;;  %1128 = vmatpush1.bf16.msra.mxu0 %v1648_v33  ;;  %v797_v5 = vshrl.u32 %v2566_v1, 16 }
 0x105   : > { %805 = vrot.lane.b32.xlu1 %v2496_v30, %s1907_s9  ;;  %1473 = vmatpush1.bf16.msra.mxu1 %v1648_v33 }
 0x106   : > { %1129 = vmatprep.subr.bf16.mxu0 %v1903_v0  ;;  %1465 = vmatprep.subr.bf16.mxu1 %v1903_v0  ;;  %v802_v8 = vor.u32 %v801_v7, %v797_v5  ;;  %v881_v7 = vrot.slane %v2587_v17, 1 }
 0x108   : > { %811 = vrot.lane.b32.xlu0 %v2434_v6, %s1907_s9  ;;  %1130 = vmatpush1.bf16.msra.mxu0 %v1649_v35 }
 0x109   : > { %813 = vrot.lane.b32.xlu1 %v719_v34, %s1907_s9  ;;  %1474 = vmatpush1.bf16.msra.mxu1 %v1649_v35 }
 0x10a   : > { %1131 = vmatprep.subr.bf16.mxu0 %v1903_v0  ;;  %1466 = vmatprep.subr.bf16.mxu1 %v1903_v0 }
 0x10c   : > { %820 = vrot.lane.b32.xlu0 %v744_v50, %s1908_s26  ;;  %1132 = vmatpush1.bf16.msra.mxu0 %v1650_v39  ;;  %v1416_v50 = vcombine.low %v2515_v38, %v2515_v38 }
 0x10d   : > { %822 = vrot.lane.b32.xlu1 %v745_v36, %s1908_s26  ;;  %1475 = vmatpush1.bf16.msra.mxu1 %v1650_v39 }
 0x10e   : > { %1133 = vmatprep.subr.bf16.mxu0 %v1903_v0  ;;  %1467 = vmatprep.subr.bf16.mxu1 %v1903_v0  ;;  %v698_v0 = vor.u32 %v697_v56, %v693_v55 }
 0x110   : > { %828 = vrot.lane.b32.xlu0 %v2450_v13, %s1908_s26  ;;  %1134 = vmatpush1.bf16.msra.mxu0 %v1651_v44 }
 0x111   : > { %830 = vrot.lane.b32.xlu1 %v749_v41, %s1908_s26  ;;  %1476 = vmatpush1.bf16.msra.mxu1 %v1651_v44 }
 0x114   : > { %839 = vrot.lane.b32.xlu0 %v2468_v20, %s1909_s0  ;;  %v861_v20 = vshll.u32 %v2587_v17, 16  ;;  %v1433_v17 = vcombine.low %v819_v12, %v881_v7 }
 0x115   : > { %841 = vrot.lane.b32.xlu1 %v1416_v50, %s1909_s0 }
 0x116   : > { %v863_v22 = vrot.slane %v861_v20, 1 }
 0x118   : > { %847 = vrot.lane.b32.xlu0 %v2485_v25, %s1909_s0  ;;  %v864_v23 = vor.u32 %v863_v22, %v859_v21 }
 0x119   : > { %849 = vrot.lane.b32.xlu1 %v1420_v54, %s1909_s0 }
 0x11c   : > { %865 = vrot.lane.b32.xlu0 %v2496_v30, %s1910_s3 }
 0x11d   : > { %867 = vrot.lane.b32.xlu1 %v698_v0, %s1910_s3 }
 0x120   : > { %873 = vrot.lane.b32.xlu0 %v719_v34, %s1910_s3 }
 0x121   : > { %875 = vrot.lane.b32.xlu1 %v726_v60, %s1910_s3 }
 0x124   : > { %731 = vrot.lane.b32.xlu0 %v2496_v30, %s1905_s15 }
 0x125   : > { %733 = vrot.lane.b32.xlu1 %v698_v0, %s1905_s15 }
 0x128   : > { %739 = vrot.lane.b32.xlu0 %v719_v34, %s1905_s15 }
 0x129   : > { %741 = vrot.lane.b32.xlu1 %v726_v60, %s1905_s15 }
 0x12c   : > { %755 = vrot.lane.b32.xlu0 %v745_v36, %s1904_s12 }
 0x12d   : > { %757 = vrot.lane.b32.xlu1 %v746_v11, %s1904_s12 }
 0x130   : > { %763 = vrot.lane.b32.xlu0 %v749_v41, %s1904_s12 }
 0x131   : > { %765 = vrot.lane.b32.xlu1 %v750_v52, %s1904_s12 }
 0x134   : > { %781 = vrot.lane.b32.xlu0 %v1416_v50, %s1906_s8 }
 0x135   : > { %783 = vrot.lane.b32.xlu1 %v1417_v63, %s1906_s8 }
 0x138   : > { %789 = vrot.lane.b32.xlu0 %v1420_v54, %s1906_s8 }
 0x139   : > { %791 = vrot.lane.b32.xlu1 %v1421_v2, %s1906_s8  ;;  %s2860_s8 = sld [smem:[#allocation18_spill]] }
 0x13c   : > { %807 = vrot.lane.b32.xlu0 %v698_v0, %s1907_s9  ;;  %v1429_v0 = vcombine.low %v2440_v9, %v2450_v13 }
 0x13d   : > { %809 = vrot.lane.b32.xlu1 %v2429_v4, %s1907_s9 }
 0x13f   : > { %s1449_s23 = sshll.u32 %s2860_s8, 4 }
 0x140   : > { %815 = vrot.lane.b32.xlu0 %v726_v60, %s1907_s9  ;;  %s1236_s21 = sadd.s32 %s1449_s23, %s1448_s14 }
 0x141   : > { %817 = vrot.lane.b32.xlu1 %v802_v8, %s1907_s9  ;;  %s1450_s5 = sshll.u32 %s1236_s21, 6 }
 0x144   : > { %824 = vrot.lane.b32.xlu0 %v746_v11, %s1908_s26 }
 0x145   : > { %826 = vrot.lane.b32.xlu1 %v2440_v9, %s1908_s26 }
 0x148   : > { %832 = vrot.lane.b32.xlu0 %v750_v52, %s1908_s26 }
 0x149   : > { %834 = vrot.lane.b32.xlu1 %v819_v12, %s1908_s26  ;;  %s2694_s26 = scalar_lea.hbm %s2861_s28, %s1450_s5 }
 0x14c   : > { %843 = vrot.lane.b32.xlu0 %v1417_v63, %s1909_s0 }
 0x14d   : > { %845 = vrot.lane.b32.xlu1 %v2478_v24, %s1909_s0 }
 0x150   : > { %851 = vrot.lane.b32.xlu0 %v1421_v2, %s1909_s0 }
 0x151   : > { %853 = vrot.lane.b32.xlu1 %v1423_v18, %s1909_s0  ;;  %s1742_s0 = scalar_lea.vmem %s2698_s1, 512 }
 0x152   : > { %p1743_p5 = scmp.ne.s32.totalorder %s2698_s1, %s1742_s0 }
 0x154   : > { %869 = vrot.lane.b32.xlu0 %v2429_v4, %s1910_s3  ;;  %p1744_p4 = pnand %p1743_p5, %p2863_p3 }
 0x155   : > { %871 = vrot.lane.b32.xlu1 %v2434_v6, %s1910_s3 }
 0x156   : > { %p1745_p10 = pneg %p1744_p4 }
 0x158   : > { %877 = vrot.lane.b32.xlu0 %v802_v8, %s1910_s3 }
 0x159   : > { %879 = vrot.lane.b32.xlu1 %v864_v23, %s1910_s3  ;;  %s1911_s3 = smov [#allocation9]  }
 0x15a   : > { %s1746_s12 = sshll.u32 %s1911_s3, 4  ;;  %s1747_s12 = int_to_ptr.vmem [resolvable:$false] %s1746_s12 }
 0x15b   : > { %s1748_s15 = scalar_lea.vmem %s1747_s12, 1024  ;;  %p1749_p12 = scmp.lt.s32.totalorder %s2698_s1, %s1747_s12 }
 0x15c   : > { %p1750_p11 = scmp.lt.s32.totalorder %s1748_s15, %s1742_s0 }
 0x15d   : > { %v754_v24 = vpop.permute.xlu1 %753 }
 0x15e   : > { %v752_v25 = vpop.permute.xlu0 %751  ;;  %p1751_p2 = por %p1750_p11, %p1749_p12 }
 0x160   : > { %p1752_p1 = pnand %p1751_p2, %p1745_p10 }
 0x162   : > { %v728_v26 = vpop.permute.xlu0 %727 }
 0x163   : > { %v736_v27 = vpop.permute.xlu1 %735  ;;  %v885_v44 = vsel %vm882_vm6, %v2413_v45, %v728_v26 }
 0x164   : > { %v909_v50 = vsel %vm907_vm7, %v885_v44, %v752_v25 }
 0x166   : > { %v730_v28 = vpop.permute.xlu0 %729 }
 0x167   : > { %v738_v29 = vpop.permute.xlu1 %737  ;;  %v888_v49 = vsel %vm882_vm6, %v2406_v42, %v730_v28  ;;  %v897_v42 = vsel %vm882_vm6, %v2415_v46, %v736_v27 }
 0x168   : > { %v911_v52 = vsel %vm907_vm7, %v888_v49, %v754_v24  ;;  %v900_v58 = vsel %vm882_vm6, %v2418_v48, %v738_v29 }
 0x16a   : > { %v760_v30 = vpop.permute.xlu0 %759 }
 0x16b   : > { %v762_v31 = vpop.permute.xlu1 %761  ;;  %v917_v59 = vsel %vm907_vm7, %v897_v42, %v760_v30 }
 0x16c   : > { %v919_v63 = vsel %vm907_vm7, %v900_v58, %v762_v31 }
 0x16e   : > { %v778_v32 = vpop.permute.xlu0 %777 }
 0x16f   : > { %v780_v33 = vpop.permute.xlu1 %779  ;;  %v926_v53 = vsel %vm924_vm8, %v909_v50, %v778_v32 }
 0x170   : > { %v928_v55 = vsel %vm924_vm8, %v911_v52, %v780_v33 }
 0x172   : > { %v786_v34 = vpop.permute.xlu0 %785 }
 0x173   : > { %v788_v4 = vpop.permute.xlu1 %787  ;;  %v934_v46 = vsel %vm924_vm8, %v917_v59, %v786_v34 }
 0x174   : > { %v936_v9 = vsel %vm924_vm8, %v919_v63, %v788_v4 }
 0x176   : > { %v804_v35 = vpop.permute.xlu0 %803 }
 0x177   : > { %v806_v36 = vpop.permute.xlu1 %805  ;;  %v943_v45 = vsel %vm941_vm9, %v926_v53, %v804_v35 }
 0x178   : > { %v945_v56 = vsel %vm941_vm9, %v928_v55, %v806_v36 }
 0x17a   : > { %v812_v6 = vpop.permute.xlu0 %811 }
 0x17b   : > { %v814_v37 = vpop.permute.xlu1 %813  ;;  %v951_v48 = vsel %vm941_vm9, %v934_v46, %v812_v6 }
 0x17c   : > { %v953_v8 = vsel %vm941_vm9, %v936_v9, %v814_v37 }
 0x17e   : > { %v821_v39 = vpop.permute.xlu0 %820 }
 0x17f   : > { %v823_v40 = vpop.permute.xlu1 %822  ;;  %v960_v57 = vsel %vm958_vm10, %v943_v45, %v821_v39 }
 0x180   : > { %v962_v60 = vsel %vm958_vm10, %v945_v56, %v823_v40 }
 0x182   : > { %v829_v41 = vpop.permute.xlu0 %828 }
 0x183   : > { %v831_v43 = vpop.permute.xlu1 %830  ;;  %v968_v14 = vsel %vm958_vm10, %v951_v48, %v829_v41 }
 0x184   : > { %v970_v18 = vsel %vm958_vm10, %v953_v8, %v831_v43 }
 0x186   : > { %v840_v11 = vpop.permute.xlu0 %839 }
 0x187   : > { %v842_v47 = vpop.permute.xlu1 %841  ;;  %v977_v61 = vsel %vm975_vm11, %v960_v57, %v840_v11 }
 0x188   : > { %v979_v2 = vsel %vm975_vm11, %v962_v60, %v842_v47 }
 0x18a   : > { %v848_v51 = vpop.permute.xlu0 %847 }
 0x18b   : > { %v850_v54 = vpop.permute.xlu1 %849  ;;  %v985_v20 = vsel %vm975_vm11, %v968_v14, %v848_v51 }
 0x18c   : > { %v987_v22 = vsel %vm975_vm11, %v970_v18, %v850_v54 }
 0x18e   : > { %v866_v62 = vpop.permute.xlu0 %865 }
 0x18f   : > { %v868_v3 = vpop.permute.xlu1 %867  ;;  %v994_v5 = vsel %vm992_vm12, %v977_v61, %v866_v62 }
 0x190   : > { %v996_v13 = vsel %vm992_vm12, %v979_v2, %v868_v3 }
 0x191   : > { %v1426_v16 = vcombine.low %v994_v5, %v996_v13 }
 0x192   : > { %v874_v21 = vpop.permute.xlu0 %873 }
 0x193   : > { %v876_v23 = vpop.permute.xlu1 %875  ;;  %1150 = vmatmul.mubr.bf16.vlgmr.msra.gmra.mrb[0].mxu0 %v1426_v16  ;;  %v1002_v24 = vsel %vm992_vm12, %v985_v20, %v874_v21 }
 0x194   : > { %v1004_v25 = vsel %vm992_vm12, %v987_v22, %v876_v23  ;;  %1444 = vmatprep.mubr.msk.bf16.mxu0 %vm882_vm6, %v1429_v0  ;;  %v1425_v22 = vld [vmem:[%s2858_s13] ss:$0 sm:$0xff] }
 0x195   : > { %v1430_v26 = vcombine.low %v1002_v24, %v1004_v25 }
 0x196   : > { %v732_v27 = vpop.permute.xlu0 %731 }
 0x197   : > { %v734_v28 = vpop.permute.xlu1 %733  ;;  %1166 = vmatmul.mubr.bf16.vlgmr.msra.gmra.mrb[0].mxu1 %v1430_v26  ;;  %v891_v49 = vsel %vm882_vm6, %v2442_v10, %v732_v27 }
 0x198   : > { %1446 = vmatprep.mubr.msk.bf16.mxu1 %vm882_vm6, %v1433_v17  ;;  %v894_v50 = vsel %vm882_vm6, %v2515_v38, %v734_v28 }
 0x19a   : > { %v740_v29 = vpop.permute.xlu0 %739 }
 0x19b   : > { %v742_v30 = vpop.permute.xlu1 %741  ;;  %v903_v56 = vsel %vm882_vm6, %v2461_v19, %v740_v29 }
 0x19c   : > { %v906_v38 = vsel %vm882_vm6, %v2527_v15, %v742_v30 }
 0x19e   : > { %v756_v31 = vpop.permute.xlu0 %755 }
 0x19f   : > { %v758_v32 = vpop.permute.xlu1 %757  ;;  %v913_v51 = vsel %vm907_vm7, %v891_v49, %v756_v31 }
 0x1a0   : > { %v915_v53 = vsel %vm907_vm7, %v894_v50, %v758_v32 }
 0x1a2   : > { %v764_v33 = vpop.permute.xlu0 %763 }
 0x1a3   : > { %v766_v34 = vpop.permute.xlu1 %765  ;;  %v921_v0 = vsel %vm907_vm7, %v903_v56, %v764_v33 }
 0x1a4   : > { %v923_v61 = vsel %vm907_vm7, %v906_v38, %v766_v34 }
 0x1a6   : > { %v782_v4 = vpop.permute.xlu0 %781 }
 0x1a7   : > { %v784_v35 = vpop.permute.xlu1 %783  ;;  %v930_v54 = vsel %vm924_vm8, %v913_v51, %v782_v4 }
 0x1a8   : > { %v932_v45 = vsel %vm924_vm8, %v915_v53, %v784_v35 }
 0x1aa   : > { %v790_v36 = vpop.permute.xlu0 %789 }
 0x1ab   : > { %v792_v6 = vpop.permute.xlu1 %791  ;;  %v938_v62 = vsel %vm924_vm8, %v921_v0, %v790_v36 }
 0x1ac   : > { %v940_v2 = vsel %vm924_vm8, %v923_v61, %v792_v6 }
 0x1ae   : > { %v808_v37 = vpop.permute.xlu0 %807 }
 0x1af   : > { %v810_v39 = vpop.permute.xlu1 %809  ;;  %v947_v42 = vsel %vm941_vm9, %v930_v54, %v808_v37 }
 0x1b0   : > { %v949_v10 = vsel %vm941_vm9, %v932_v45, %v810_v39 }
 0x1b2   : > { %v816_v1 = vpop.permute.xlu0 %815 }
 0x1b3   : > { %v818_v12 = vpop.permute.xlu1 %817  ;;  %v955_v15 = vsel %vm941_vm9, %v938_v62, %v816_v1 }
 0x1b4   : > { %v957_v5 = vsel %vm941_vm9, %v940_v2, %v818_v12 }
 0x1b6   : > { %v825_v40 = vpop.permute.xlu0 %824 }
 0x1b7   : > { %v827_v41 = vpop.permute.xlu1 %826  ;;  %v964_v57 = vsel %vm958_vm10, %v947_v42, %v825_v40 }
 0x1b8   : > { %v966_v58 = vsel %vm958_vm10, %v949_v10, %v827_v41 }
 0x1ba   : > { %v833_v43 = vpop.permute.xlu0 %832 }
 0x1bb   : > { %v835_v11 = vpop.permute.xlu1 %834  ;;  %v972_v9 = vsel %vm958_vm10, %v955_v15, %v833_v43 }
 0x1bc   : > { %v974_v13 = vsel %vm958_vm10, %v957_v5, %v835_v11 }
 0x1be   : > { %v844_v44 = vpop.permute.xlu0 %843 }
 0x1bf   : > { %v846_v47 = vpop.permute.xlu1 %845  ;;  %v981_v59 = vsel %vm975_vm11, %v964_v57, %v844_v44 }
 0x1c0   : > { %v983_v19 = vsel %vm975_vm11, %v966_v58, %v846_v47 }
 0x1c2   : > { %v852_v52 = vpop.permute.xlu0 %851 }
 0x1c3   : > { %v854_v55 = vpop.permute.xlu1 %853  ;;  %v989_v7 = vsel %vm975_vm11, %v972_v9, %v852_v52 }
 0x1c4   : > { %v991_v14 = vsel %vm975_vm11, %v974_v13, %v854_v55 }
 0x1c6   : > { %v870_v60 = vpop.permute.xlu0 %869 }
 0x1c7   : > { %v872_v63 = vpop.permute.xlu1 %871  ;;  %v998_v46 = vsel %vm992_vm12, %v981_v59, %v870_v60 }
 0x1c8   : > { %v1000_v3 = vsel %vm992_vm12, %v983_v19, %v872_v63 }
 0x1c9   : > { %v1428_v48 = vcombine.low %v998_v46, %v1000_v3 }
 0x1ca   : > { %v878_v8 = vpop.permute.xlu0 %877 }
 0x1cb   : > { %v880_v16 = vpop.permute.xlu1 %879  ;;  %1158 = vmatmul.mubr.bf16.gmra.mrb[4].mxu0 %v1428_v48  ;;  %v1006_v18 = vsel %vm992_vm12, %v989_v7, %v878_v8 }
 0x1cc   : > { %v1008_v20 = vsel %vm992_vm12, %v991_v14, %v880_v16 }
 0x1cd   : > { %v1432_v21 = vcombine.low %v1006_v18, %v1008_v20 }
 0x1cf   : > { %1174 = vmatmul.mubr.bf16.gmra.mrb[4].mxu1 %v1432_v21 }
 0x266   : > { %v1151_v23 = vpop.f32.mrb[0].mxu0 }
 0x267   : > { %v1152_v24 = vadd.f32 %v1425_v22, %v1151_v23  ;;  %v1153_v25 = vpop.f32.mrb[1].mxu0 }
 0x268   : > { %v1154_v17 = vpop.f32.mrb[2].mxu0 }
 0x269   : > { %vm1182_vm13 = vcmp.ge.f32.partialorder %v1152_v24, 0.0  ;;  %v1190_v26 = vmul.f32 0.1, %v1152_v24  ;;  %v1155_v27 = vadd.f32 %v1425_v22, %v1154_v17  ;;  %v1156_v28 = vpop.f32.mrb[3].mxu0 }
 0x26a   : > { %v1167_v29 = vpop.f32.mrb[0].mxu1 }
 0x26b   : > { %v1198_v30 = vsel %vm1182_vm13, %v1152_v24, %v1190_v26  ;;  %vm1183_vm15 = vcmp.ge.f32.partialorder %v1155_v27, 0.0  ;;  %v1191_v31 = vmul.f32 0.1, %v1155_v27  ;;  %v1168_v32 = vadd.f32 %v1425_v22, %v1167_v29  ;;  %v1169_v33 = vpop.f32.mrb[1].mxu1 }
 0x26c   : > { %v1206_v34 = vpack.c.bf16 %v1198_v30, %v1198_v30  ;;  %v1170_v4 = vpop.f32.mrb[2].mxu1 }
 0x26d   : > { %v1199_v35 = vsel %vm1183_vm15, %v1155_v27, %v1191_v31  ;;  %vm1186_vm0 = vcmp.ge.f32.partialorder %v1168_v32, 0.0  ;;  %v1194_v36 = vmul.f32 0.1, %v1168_v32  ;;  %v1171_v6 = vadd.f32 %v1425_v22, %v1170_v4  ;;  %v1172_v37 = vpop.f32.mrb[3].mxu1 }
 0x26e   : > { %1215 = vst.msk [vmem:[%s2390_s7] sm:$0xf] %vm1214_vm14, %v1206_v34  ;;  %v1207_v39 = vpack.c.bf16 %v1199_v35, %v1199_v35 }
 0x26f   : > { %v1202_v1 = vsel %vm1186_vm0, %v1168_v32, %v1194_v36  ;;  %vm1187_vm1 = vcmp.ge.f32.partialorder %v1171_v6, 0.0  ;;  %v1195_v12 = vmul.f32 0.1, %v1171_v6 }
 0x270   : > { %1216 = vst.msk [vmem:[%s2390_s7 + $0x4] sm:$0xf] %vm1214_vm14, %v1207_v39  ;;  %v1210_v40 = vpack.c.bf16 %v1202_v1, %v1202_v1 }
 0x271   : > { %v1203_v41 = vsel %vm1187_vm1, %v1171_v6, %v1195_v12 }
 0x272   : > { %1219 = vst.msk [vmem:[%s2390_s7 + $0x10] sm:$0xf] %vm1214_vm14, %v1210_v40  ;;  %v1211_v43 = vpack.c.bf16 %v1203_v41, %v1203_v41 }
 0x274   : > { %1220 = vst.msk [vmem:[%s2390_s7 + $0x14] sm:$0xf] %vm1214_vm14, %v1211_v43 }
 0x29e   : > { %v1159_v11 = vpop.f32.mrb[4].mxu0 }
 0x29f   : > { %v1160_v44 = vadd.f32 %v1425_v22, %v1159_v11  ;;  %v1161_v47 = vpop.f32.mrb[5].mxu0 }
 0x2a0   : > { %v1162_v49 = vpop.f32.mrb[6].mxu0 }
 0x2a1   : > { %vm1184_vm2 = vcmp.ge.f32.partialorder %v1160_v44, 0.0  ;;  %v1192_v50 = vmul.f32 0.1, %v1160_v44  ;;  %v1163_v51 = vadd.f32 %v1425_v22, %v1162_v49  ;;  %v1164_v52 = vpop.f32.mrb[7].mxu0 }
 0x2a2   : > { %v1175_v53 = vpop.f32.mrb[4].mxu1 }
 0x2a3   : > { %v1200_v54 = vsel %vm1184_vm2, %v1160_v44, %v1192_v50  ;;  %vm1185_vm3 = vcmp.ge.f32.partialorder %v1163_v51, 0.0  ;;  %v1193_v55 = vmul.f32 0.1, %v1163_v51  ;;  %v1176_v45 = vadd.f32 %v1425_v22, %v1175_v53  ;;  %v1177_v42 = vpop.f32.mrb[5].mxu1 }
 0x2a4   : > { %v1208_v56 = vpack.c.bf16 %v1200_v54, %v1200_v54  ;;  %v1178_v10 = vpop.f32.mrb[6].mxu1 }
 0x2a5   : > { %v1201_v57 = vsel %vm1185_vm3, %v1163_v51, %v1193_v55  ;;  %vm1188_vm4 = vcmp.ge.f32.partialorder %v1176_v45, 0.0  ;;  %v1196_v38 = vmul.f32 0.1, %v1176_v45  ;;  %v1179_v0 = vadd.f32 %v1425_v22, %v1178_v10  ;;  %v1180_v58 = vpop.f32.mrb[7].mxu1 }
 0x2a6   : > { %1217 = vst.msk [vmem:[%s2390_s7 + $0x8] sm:$0xf] %vm1214_vm14, %v1208_v56  ;;  %v1209_v59 = vpack.c.bf16 %v1201_v57, %v1201_v57 }
 0x2a7   : > { %v1204_v60 = vsel %vm1188_vm4, %v1176_v45, %v1196_v38  ;;  %vm1189_vm5 = vcmp.ge.f32.partialorder %v1179_v0, 0.0  ;;  %v1197_v61 = vmul.f32 0.1, %v1179_v0 }
 0x2a8   : > { %1218 = vst.msk [vmem:[%s2390_s7 + $0xc] sm:$0xf] %vm1214_vm14, %v1209_v59  ;;  %v1212_v62 = vpack.c.bf16 %v1204_v60, %v1204_v60 }
 0x2a9   : > { %v1205_v19 = vsel %vm1189_vm5, %v1179_v0, %v1197_v61 }
 0x2aa   : > { %1221 = vst.msk [vmem:[%s2390_s7 + $0x18] sm:$0xf] %vm1214_vm14, %v1212_v62  ;;  %v1213_v63 = vpack.c.bf16 %v1205_v19, %v1205_v19 }
 0x2ac   : > { %1222 = vst.msk [vmem:[%s2390_s7 + $0x1c] sm:$0xf] %vm1214_vm14, %v1213_v63 }
 0x2ad   : > { %1755 = shalt.err (!%p1752_p1)
}
 0x2ae   : > { %s1756_s7 = scalar_lea.hbm %s2694_s26, 512  ;;  %s1760_s8 = scalar_lea.hbm %s2862_s17, 2048 }
 0x2af   : > { %p1757_p7 = scmp.ne.s32.totalorder %s2694_s26, %s1756_s7  ;;  %p1761_p8 = scmp.lt.u32.totalorder %s2694_s26, %s2862_s17 }
 0x2b0   : > { %p1762_p9 = scmp.lt.u32.totalorder %s1760_s8, %s1756_s7  ;;  %p1764_p5 = scmp.lt.u32.totalorder %s1756_s7, %s2694_s26 }
 0x2b1   : > { %p1758_p6 = pnand %p1757_p7, %p2863_p3 }
 0x2b2   : > { %p1763_p0 = por %p1762_p9, %p1761_p8 }
 0x2b3   : > { %p1759_p13 = pneg %p1758_p6 }
 0x2b4   : > { %p1765_p4 = por %p1764_p5, %p1763_p0 }
 0x2b6   : > { %p1766_p10 = pnand %p1765_p4, %p1759_p13 }
 0x2b8   : > { %1769 = shalt.err (!%p1766_p10)
}
 0x2b9   : > { %s1912_s21 = smov 4  }
 0x2ba   : > { %1483 = dma.vmem_to_hbm [thread:$0]  (%p2863_p3), %s2698_s1, 512, %s2694_s26, %s1224_s22, %s1907_s9, %s1907_s9, %s1912_s21  }
 0x2bb PF: > { %p1500_p12 = scmp.ge.s32.totalorder %s1896_s6, 2  ;;  %s1254_s5 = sand.u32 1, %s1868_s24  }
 0x2bc   : > { %p2864_p11 = scmp.ne.s32.totalorder %s2833_s16, 0  ;;  %s1255_s27 = scalar_lea.sflag [#allocation5], %s1254_s5 }
 0x2be   : > { %p1496_p2 = pnand %p1500_p12, %p2864_p11 }
 0x2c0   : > { %1839 = dma.done.wait (!%p1496_p2), %s1255_s27, 512  }
 0x2c1   : > { %1841 = vsyncadd (!%p1496_p2), %s1255_s27, 4294966784  ;;  %s24_s6 = sadd.s32 1, %s1896_s6   ;;  %s2866_s21 = sld [smem:[#allocation14_spill]] }
 0x2c2   : > { %p2733_p1 = scmp.ge.s32.totalorder %s24_s6, 6   ;;  %s2867_s22 = sld [smem:[#allocation15_spill]] }
 0x2c3   : > { %s2868_s23 = sld [smem:[#allocation24_spill]]  ;;  %s2869_s11 = sld [smem:[#allocation16_spill]] }
 0x2c4   : > { %s2870_s26 = sld [smem:[#allocation25_spill]]  ;;  %s2871_s27 = sld [smem:[#allocation19_spill]] }
 0x2c5   : > { %s2872_s28 = sld [smem:[#allocation20_spill]]  ;;  %s2873_s29 = sld [smem:[#allocation21_spill]] }
 0x2c6   : > { %s2874_s16 = sld [smem:[#allocation22_spill]]  ;;  %s2876_s18 = smov %s1848_s19 }
 0x2c7   : > { %s2877_s19 = smov %s1852_s20  ;;  %s2878_s20 = smov %s2224_s10 }
 0x2c8   : > { %s2879_s24 = smov %s1872_s25  ;;  %23 = sbr.rel (!%p2733_p1) target bundleno = 18 (0x12), region = 119 }
 0x2c9   : > { %s2880_s25 = smov %s2869_s11 }
 0x2cc   : > { %s2881_s30 = smov %s2874_s16 }
 0x2cf   :  { %1260 = vsyncpa [#allocation4], 1 }
 0x2d0   :  { %1262 = vsyncpa [#allocation4 + $0x1], 1 }
 0x2d1   :  { %1263 = vsyncpa [#allocation7], 1 }
 0x2d2   :  { %1265 = vsyncpa [#allocation7 + $0x1], 1 }
 0x2d3   :  { %1266 = vsyncpa [#allocation5], 1 }
 0x2d4   :  { %1268 = vsyncpa [#allocation5 + $0x1], 1 }

</bundles_post_ra>
